<compile_context>
chip_gen: v7x
topology: tpu7x:2x2x1
jax: 0.10.0
libtpu: 0.0.40
codegen_flags: <defaults>
</compile_context>

<pallas_src>
import functools
import math

import jax
import jax.numpy as jnp
from jax.experimental import pallas as pl
from jax.experimental.pallas import tpu as pltpu


# ---------------------------------------------------------------------------
# In-kernel helpers
# ---------------------------------------------------------------------------
def _layernorm(x, w, b, eps=1e-5):
    mu = jnp.mean(x, axis=-1, keepdims=True)
    var = jnp.mean((x - mu) ** 2, axis=-1, keepdims=True)
    return (x - mu) * jax.lax.rsqrt(var + eps) * w + b


# ---------------------------------------------------------------------------
# Kernel: one encoder layer for one batch row per grid step (b, l).
# Residual stream lives in x_scr (VMEM) across the layer axis.
# ---------------------------------------------------------------------------
def encoder_layer_kernel(src_ref, pos_ref,
                         wqk_ref, bqk_ref, wv_ref, bv_ref,
                         wo_ref, bo_ref, ln1w_ref, ln1b_ref,
                         w1_ref, b1_ref, w2_ref, b2_ref,
                         ln2w_ref, ln2b_ref,
                         normw_ref, normb_ref,
                         out_ref,
                         x_scr, ho_scr,
                         *, num_heads, apply_final_norm):
    l = pl.program_id(1)
    n_layers = pl.num_programs(1)
    S, D = x_scr.shape
    Dh = D // num_heads
    scale = 1.0 / math.sqrt(Dh)

    # ----- layer 0: load the residual stream for this batch row ------------
    @pl.when(l == 0)
    def _():
        x_scr[...] = src_ref[0].astype(jnp.float32)

    x = x_scr[...]                                  # [S, D] f32 residual
    p = pos_ref[0].astype(jnp.float32)              # [S, D]

    # ----- self-attention ---------------------------------------------------
    q_in = (x + p).astype(jnp.bfloat16)             # q = k = src + pos
    # fused Q+K projection: [S, D] @ [D, 2D]
    qk = jnp.dot(q_in, wqk_ref[0],
                 preferred_element_type=jnp.float32) + bqk_ref[0]
    v = jnp.dot(x.astype(jnp.bfloat16), wv_ref[0],
                preferred_element_type=jnp.float32) + bv_ref[0]

    q = (qk[:, :D] * scale).astype(jnp.bfloat16)    # bias then scale (PyTorch)
    k = qk[:, D:].astype(jnp.bfloat16)
    vb = v.astype(jnp.bfloat16)

    for h in range(num_heads):                      # static, small head count
        c = h * Dh
        qh = q[:, c:c + Dh]                         # [S, Dh]
        kh = k[:, c:c + Dh]
        vh = vb[:, c:c + Dh]
        # scores = q_h @ k_h^T without an explicit transpose
        s = jax.lax.dot_general(qh, kh, (((1,), (1,)), ((), ())),
                                preferred_element_type=jnp.float32)   # [S, S]
        s = s - jnp.max(s, axis=-1, keepdims=True)
        e = jnp.exp(s)
        inv = pl.reciprocal(jnp.sum(e, axis=-1, keepdims=True), approx=True)
        a = (e * inv).astype(jnp.bfloat16)
        ho = jnp.dot(a, vh, preferred_element_type=jnp.float32)       # [S, Dh]
        # stash the head output in its lane slice; one full-K out-proj below
        ho_scr[:, c:c + Dh] = ho.astype(jnp.bfloat16)

    # single full-K output projection: [S, D] @ [D, D]
    attn = jnp.dot(ho_scr[...], wo_ref[0],
                   preferred_element_type=jnp.float32) + bo_ref[0]

    # ----- residual + LayerNorm 1 -------------------------------------------
    x1 = _layernorm(x + attn, ln1w_ref[0], ln1b_ref[0])

    # ----- FFN: Linear1 -> ReLU -> Linear2 ----------------------------------
    h1 = jnp.maximum(
        jnp.dot(x1.astype(jnp.bfloat16), w1_ref[0],
                preferred_element_type=jnp.float32) + b1_ref[0],
        0.0).astype(jnp.bfloat16)                   # bf16 right after ReLU
    h2 = jnp.dot(h1, w2_ref[0], preferred_element_type=jnp.float32) + b2_ref[0]

    # ----- residual + LayerNorm 2 -------------------------------------------
    x_scr[...] = _layernorm(x1 + h2, ln2w_ref[0], ln2b_ref[0])

    # ----- last layer: optional final LayerNorm + write the output block ----
    @pl.when(l == n_layers - 1)
    def _():
        xo = x_scr[...]
        if apply_final_norm:
            xo = _layernorm(xo, normw_ref[...], normb_ref[...])
        out_ref[0] = xo.astype(out_ref.dtype)


# ---------------------------------------------------------------------------
# Wrapper: weight prep (pre-transpose / bf16 / optional layer stacking)
# ---------------------------------------------------------------------------
def prepare_stacked_params(per_layer, d_model):
    """PyTorch-shaped per-layer params -> stacked, pre-transposed kernel params.

    Leading axis has length len(per_layer): 1 if weights are shared across
    layers, num_layers if they differ.
    """
    D = d_model
    bf16 = jnp.bfloat16

    def stack(fn, dtype=jnp.float32):
        return jnp.stack([fn(p) for p in per_layer], axis=0).astype(dtype)

    return {
        # fused Q+K projection weight [Lw, D, 2D] and V weight [Lw, D, D]
        "wqk_t": stack(lambda p: p["wqkv"][:2 * D, :].T, bf16),
        "bqk":   stack(lambda p: p["bqkv"].reshape(1, 3 * D)[:, :2 * D]),
        "wv_t":  stack(lambda p: p["wqkv"][2 * D:, :].T, bf16),
        "bv":    stack(lambda p: p["bqkv"].reshape(1, 3 * D)[:, 2 * D:]),
        # out-proj, transposed, full-K: [Lw, D, D]
        "wo_t":  stack(lambda p: p["wo"].T, bf16),
        "bo":    stack(lambda p: p["bo"].reshape(1, D)),
        "ln1w":  stack(lambda p: p["ln1w"].reshape(1, D)),
        "ln1b":  stack(lambda p: p["ln1b"].reshape(1, D)),
        # FFN weights pre-transposed: [Lw, D, FF] and [Lw, FF, D]
        "w1_t":  stack(lambda p: p["w1"].T, bf16),
        "b1":    stack(lambda p: p["b1"].reshape(1, -1)),
        "w2_t":  stack(lambda p: p["w2"].T, bf16),
        "b2":    stack(lambda p: p["b2"].reshape(1, D)),
        "ln2w":  stack(lambda p: p["ln2w"].reshape(1, D)),
        "ln2b":  stack(lambda p: p["ln2b"].reshape(1, D)),
    }


def _vmem_limit_bytes():
    """Generation-aware scoped-VMEM limit (leave ~25% headroom)."""
    try:
        cap = getattr(pltpu.get_tpu_info(), "vmem_capacity_bytes", None)
    except Exception:
        cap = None
    if not cap:
        return 32 * 1024 * 1024          # conservative fallback
    return int(cap * 3 // 4)             # ~48 MiB on v7x, ~96 MiB on v5e/v6e


def transformer_encoder(src_sbd, pos_sbd, layer_params, num_layers, num_heads,
                        norm_params=None):
    """Mirrors TransformerEncoder.forward.

    src_sbd / pos_sbd: [S, B, D] (PyTorch / DETR seq-first layout).
    layer_params: a single dict (shared across layers, matching
                  copy.deepcopy-at-init) or a list of num_layers dicts.
    """
    S, B, D = src_sbd.shape

    shared_weights = isinstance(layer_params, dict)
    if shared_weights:
        per_layer = [layer_params]            # keep ONE copy, index block 0
    else:
        per_layer = list(layer_params)
        assert len(per_layer) == num_layers
    stacked = prepare_stacked_params(per_layer, D)
    FF = stacked["w1_t"].shape[-1]

    if norm_params is not None:
        normw = norm_params["w"].reshape(1, D).astype(jnp.float32)
        normb = norm_params["b"].reshape(1, D).astype(jnp.float32)
        apply_final_norm = True
    else:
        normw = jnp.ones((1, D), jnp.float32)
        normb = jnp.zeros((1, D), jnp.float32)
        apply_final_norm = False

    # Single [S,B,D] <-> [B,S,D] transpose pair around ONE fused kernel.
    x = jnp.transpose(src_sbd, (1, 0, 2))
    pos = jnp.transpose(pos_sbd, (1, 0, 2))

    # grid = (B, L): batch "parallel" (megacore), layer "arbitrary" (carried
    # residual in VMEM scratch, per-layer weight streaming).
    row_spec = pl.BlockSpec((1, S, D), lambda b, l: (b, 0, 0))

    def w_spec(arr):
        nd = arr.ndim
        blk = (1,) + arr.shape[1:]
        if shared_weights:
            imap = lambda b, l, _nd=nd: (0,) * _nd          # resident once
        else:
            imap = lambda b, l, _nd=nd: (l,) + (0,) * (_nd - 1)  # stream layer l
        return pl.BlockSpec(blk, imap)

    norm_spec = pl.BlockSpec((1, D), lambda b, l: (0, 0))

    param_order = ("wqk_t", "bqk", "wv_t", "bv", "wo_t", "bo", "ln1w", "ln1b",
                   "w1_t", "b1", "w2_t", "b2", "ln2w", "ln2b")
    param_args = [stacked[k] for k in param_order]
    param_specs = [w_spec(a) for a in param_args]

    all_args = [x, pos] + param_args + [normw, normb]
    all_specs = [row_spec, row_spec] + param_specs + [norm_spec, norm_spec]

    # Advisory cost estimate so XLA treats the fused call as long-running.
    flops_per_row_layer = (
        2 * S * D * (2 * D)        # fused Q+K projection
        + 2 * S * D * D            # V projection
        + 2 * S * S * D            # scores (all heads)
        + 2 * S * S * D            # attn @ V (all heads)
        + 2 * S * D * D            # output projection
        + 2 * S * D * FF           # FFN linear 1
        + 2 * S * FF * D           # FFN linear 2
    )
    weight_bytes = sum(int(a.size) * a.dtype.itemsize for a in param_args)
    cost = pl.CostEstimate(
        flops=int(B * num_layers * flops_per_row_layer),
        transcendentals=int(B * num_layers * num_heads * S * S),
        bytes_accessed=int(3 * B * S * D * 4 + weight_bytes),
    )

    kernel = functools.partial(encoder_layer_kernel,
                               num_heads=num_heads,
                               apply_final_norm=apply_final_norm)

    out = pl.pallas_call(
        kernel,
        out_shape=jax.ShapeDtypeStruct((B, S, D), src_sbd.dtype),
        grid_spec=pltpu.PrefetchScalarGridSpec(
            num_scalar_prefetch=0,
            grid=(B, num_layers),
            in_specs=all_specs,
            out_specs=row_spec,
            scratch_shapes=[
                pltpu.VMEM((S, D), jnp.float32),    # residual stream carry
                pltpu.VMEM((S, D), jnp.bfloat16),   # per-head output stash
            ],
        ),
        compiler_params=pltpu.CompilerParams(
            dimension_semantics=("parallel", "arbitrary"),
            vmem_limit_bytes=_vmem_limit_bytes(),
        ),
        cost_estimate=cost,
    )(*all_args)

    return jnp.transpose(out, (1, 0, 2))


# ---------------------------------------------------------------------------
# Deterministic parameter init (synthetic, PyTorch-shaped)
# ---------------------------------------------------------------------------
def init_layer_params(key, d_model, dim_ff):
    ks = jax.random.split(key, 12)
    s_attn = 1.0 / math.sqrt(d_model)
    s_ff1 = 1.0 / math.sqrt(d_model)
    s_ff2 = 1.0 / math.sqrt(dim_ff)
    return {
        # MultiheadAttention packed in_proj: [3D, D], in_proj_bias: [1, 3D]
        "wqkv": jax.random.normal(ks[0], (3 * d_model, d_model), jnp.float32) * s_attn,
        "bqkv": jax.random.normal(ks[1], (1, 3 * d_model), jnp.float32) * 0.1,
        "wo":   jax.random.normal(ks[2], (d_model, d_model), jnp.float32) * s_attn,
        "bo":   jax.random.normal(ks[3], (1, d_model), jnp.float32) * 0.1,
        "ln1w": 1.0 + 0.1 * jax.random.normal(ks[4], (1, d_model), jnp.float32),
        "ln1b": 0.1 * jax.random.normal(ks[5], (1, d_model), jnp.float32),
        # FFN: Linear(d_model -> dim_ff) then Linear(dim_ff -> d_model)
        "w1":   jax.random.normal(ks[6], (dim_ff, d_model), jnp.float32) * s_ff1,
        "b1":   jax.random.normal(ks[7], (1, dim_ff), jnp.float32) * 0.1,
        "w2":   jax.random.normal(ks[8], (d_model, dim_ff), jnp.float32) * s_ff2,
        "b2":   jax.random.normal(ks[9], (1, d_model), jnp.float32) * 0.1,
        "ln2w": 1.0 + 0.1 * jax.random.normal(ks[10], (1, d_model), jnp.float32),
        "ln2b": 0.1 * jax.random.normal(ks[11], (1, d_model), jnp.float32),
    }


# ---------------------------------------------------------------------------
# Pure-JAX reference (f32) for correctness check
# ---------------------------------------------------------------------------
def reference_encoder(src_sbd, pos_sbd, per_layer_params, num_heads, norm_params=None):
    S, B, D = src_sbd.shape
    H = num_heads
    Dh = D // H

    def ln(v, w, b, eps=1e-5):
        mu = jnp.mean(v, axis=-1, keepdims=True)
        var = jnp.mean((v - mu) ** 2, axis=-1, keepdims=True)
        return (v - mu) * jax.lax.rsqrt(var + eps) * w + b

    x = src_sbd
    for p in per_layer_params:
        wqkv = p["wqkv"]
        bqkv = p["bqkv"].reshape(-1)
        q_in = x + pos_sbd
        q = q_in @ wqkv[:D].T + bqkv[:D]
        k = q_in @ wqkv[D:2 * D].T + bqkv[D:2 * D]
        v = x @ wqkv[2 * D:].T + bqkv[2 * D:]
        q = q / math.sqrt(Dh)
        qh = q.reshape(S, B, H, Dh)
        kh = k.reshape(S, B, H, Dh)
        vh = v.reshape(S, B, H, Dh)
        s = jnp.einsum("sbhd,tbhd->bhst", qh, kh)
        a = jax.nn.softmax(s, axis=-1)
        o = jnp.einsum("bhst,tbhd->sbhd", a, vh).reshape(S, B, D)
        attn = o @ p["wo"].T + p["bo"].reshape(-1)
        x1 = ln(x + attn, p["ln1w"].reshape(-1), p["ln1b"].reshape(-1))
        h1 = jax.nn.relu(x1 @ p["w1"].T + p["b1"].reshape(-1))
        h2 = h1 @ p["w2"].T + p["b2"].reshape(-1)
        x = ln(x1 + h2, p["ln2w"].reshape(-1), p["ln2b"].reshape(-1))
    if norm_params is not None:
        x = ln(x, norm_params["w"].reshape(-1), norm_params["b"].reshape(-1))
    return x


def _check_close(out, ref, tag, atol=0.06, rtol=0.06):
    diff = jnp.abs(out - ref)
    ok = bool(jnp.all(diff <= atol + rtol * jnp.abs(ref)))
    assert ok, (f"{tag}: max abs diff {float(jnp.max(diff)):.4f} exceeds "
                f"atol={atol} rtol={rtol}")


if __name__ == "__main__":
    # Small shapes: seq=8, batch=2, d_model=32, heads=4, ffn=64, layers=2.
    S, B, D, H, FF, L = 8, 2, 32, 4, 64, 2

    key = jax.random.PRNGKey(0)
    k_src, k_pos, k_par, k_nw, k_nb, k_par2 = jax.random.split(key, 6)

    src = jax.random.normal(k_src, (S, B, D), jnp.float32)   # [S, B, D] seq-first
    pos = jax.random.normal(k_pos, (S, B, D), jnp.float32)

    layer_params = init_layer_params(k_par, D, FF)            # shared across layers
    norm_params = {
        "w": 1.0 + 0.1 * jax.random.normal(k_nw, (1, D), jnp.float32),
        "b": 0.1 * jax.random.normal(k_nb, (1, D), jnp.float32),
    }

    # --- case 1: shared weights (matches copy.deepcopy-at-init semantics) ---
    out = transformer_encoder(src, pos, layer_params, num_layers=L,
                              num_heads=H, norm_params=norm_params)
    out = jax.block_until_ready(out)
    assert out.shape == (S, B, D)
    assert bool(jnp.all(jnp.isfinite(out)))
    ref = reference_encoder(src, pos, [layer_params] * L, H, norm_params)
    _check_close(out, ref, "shared-weights")

    # --- case 2: distinct per-layer weights (exercises layer streaming) -----
    per_layer = [init_layer_params(k, D, FF) for k in jax.random.split(k_par2, L)]
    out2 = transformer_encoder(src, pos, per_layer, num_layers=L,
                               num_heads=H, norm_params=None)
    out2 = jax.block_until_ready(out2)
    ref2 = reference_encoder(src, pos, per_layer, H, None)
    _check_close(out2, ref2, "per-layer-weights")

    print("KERNEL_OK")
</pallas_src>

<mosaic_0001>
module attributes {stable_mosaic.version = 11 : i64} {
  func.func @encoder_layer_kernel(%arg0: i32, %arg1: i32, %arg2: memref<1x8x32xf32, #tpu.memory_space<vmem>>, %arg3: memref<1x8x32xf32, #tpu.memory_space<vmem>>, %arg4: memref<1x32x64xbf16, #tpu.memory_space<vmem>>, %arg5: memref<1x1x64xf32, #tpu.memory_space<vmem>>, %arg6: memref<1x32x32xbf16, #tpu.memory_space<vmem>>, %arg7: memref<1x1x32xf32, #tpu.memory_space<vmem>>, %arg8: memref<1x32x32xbf16, #tpu.memory_space<vmem>>, %arg9: memref<1x1x32xf32, #tpu.memory_space<vmem>>, %arg10: memref<1x1x32xf32, #tpu.memory_space<vmem>>, %arg11: memref<1x1x32xf32, #tpu.memory_space<vmem>>, %arg12: memref<1x32x64xbf16, #tpu.memory_space<vmem>>, %arg13: memref<1x1x64xf32, #tpu.memory_space<vmem>>, %arg14: memref<1x64x32xbf16, #tpu.memory_space<vmem>>, %arg15: memref<1x1x32xf32, #tpu.memory_space<vmem>>, %arg16: memref<1x1x32xf32, #tpu.memory_space<vmem>>, %arg17: memref<1x1x32xf32, #tpu.memory_space<vmem>>, %arg18: memref<1x32xf32, #tpu.memory_space<vmem>>, %arg19: memref<1x32xf32, #tpu.memory_space<vmem>>, %arg20: memref<1x8x32xf32, #tpu.memory_space<vmem>>, %arg21: memref<8x32xf32, #tpu.memory_space<vmem>>, %arg22: memref<8x32xbf16, #tpu.memory_space<vmem>>) attributes {dimension_semantics = [#tpu.dimension_semantics<parallel>, #tpu.dimension_semantics<arbitrary>], iteration_bounds = array<i64: 2, 2>, scalar_prefetch = 0 : i64, scratch_operands = 2 : i64, tpu.core_type = #tpu.core_type<tc>, window_params = [{transform_indices = @transform_0, window_bounds = array<i64: 1, 8, 32>}, {transform_indices = @transform_1, window_bounds = array<i64: 1, 8, 32>}, {pipeline_mode = #tpu.pipeline_mode<synchronous>, transform_indices = @transform_2, window_bounds = array<i64: 1, 32, 64>}, {pipeline_mode = #tpu.pipeline_mode<synchronous>, transform_indices = @transform_3, window_bounds = array<i64: 1, 1, 64>}, {pipeline_mode = #tpu.pipeline_mode<synchronous>, transform_indices = @transform_4, window_bounds = array<i64: 1, 32, 32>}, {pipeline_mode = #tpu.pipeline_mode<synchronous>, transform_indices = @transform_5, window_bounds = array<i64: 1, 1, 32>}, {pipeline_mode = #tpu.pipeline_mode<synchronous>, transform_indices = @transform_6, window_bounds = array<i64: 1, 32, 32>}, {pipeline_mode = #tpu.pipeline_mode<synchronous>, transform_indices = @transform_7, window_bounds = array<i64: 1, 1, 32>}, {pipeline_mode = #tpu.pipeline_mode<synchronous>, transform_indices = @transform_8, window_bounds = array<i64: 1, 1, 32>}, {pipeline_mode = #tpu.pipeline_mode<synchronous>, transform_indices = @transform_9, window_bounds = array<i64: 1, 1, 32>}, {pipeline_mode = #tpu.pipeline_mode<synchronous>, transform_indices = @transform_10, window_bounds = array<i64: 1, 32, 64>}, {pipeline_mode = #tpu.pipeline_mode<synchronous>, transform_indices = @transform_11, window_bounds = array<i64: 1, 1, 64>}, {pipeline_mode = #tpu.pipeline_mode<synchronous>, transform_indices = @transform_12, window_bounds = array<i64: 1, 64, 32>}, {pipeline_mode = #tpu.pipeline_mode<synchronous>, transform_indices = @transform_13, window_bounds = array<i64: 1, 1, 32>}, {pipeline_mode = #tpu.pipeline_mode<synchronous>, transform_indices = @transform_14, window_bounds = array<i64: 1, 1, 32>}, {pipeline_mode = #tpu.pipeline_mode<synchronous>, transform_indices = @transform_15, window_bounds = array<i64: 1, 1, 32>}, {pipeline_mode = #tpu.pipeline_mode<synchronous>, transform_indices = @transform_16, window_bounds = array<i64: 1, 32>}, {pipeline_mode = #tpu.pipeline_mode<synchronous>, transform_indices = @transform_17, window_bounds = array<i64: 1, 32>}, {transform_indices = @transform_18, window_bounds = array<i64: 1, 8, 32>}]} {
    %c0_i32 = arith.constant 0 : i32
    %0 = arith.cmpi eq, %arg1, %c0_i32 : i32
    %1 = arith.extui %0 : i1 to i32
    %c0_i32_0 = arith.constant 0 : i32
    %2 = arith.cmpi ne, %1, %c0_i32_0 : i32
    scf.if %2 {
      %c0_89 = arith.constant 0 : index
      %c0_90 = arith.constant 0 : index
      %c0_91 = arith.constant 0 : index
      %186 = vector.load %arg2[%c0_89, %c0_90, %c0_91] : memref<1x8x32xf32, #tpu.memory_space<vmem>>, vector<1x8x32xf32>
      %187 = vector.shape_cast %186 : vector<1x8x32xf32> to vector<8x32xf32>
      %c0_92 = arith.constant 0 : index
      %c0_93 = arith.constant 0 : index
      %188 = vector.load %arg21[%c0_92, %c0_93] : memref<8x32xf32, #tpu.memory_space<vmem>>, vector<8x32xf32>
      tpu.vector_store %arg21[%c0_92, %c0_93], %187 {strides = array<i32>} : memref<8x32xf32, #tpu.memory_space<vmem>>, vector<8x32xf32>,
    } else {
    }
    %c0 = arith.constant 0 : index
    %c0_1 = arith.constant 0 : index
    %3 = vector.load %arg21[%c0, %c0_1] : memref<8x32xf32, #tpu.memory_space<vmem>>, vector<8x32xf32>
    %c0_2 = arith.constant 0 : index
    %c0_3 = arith.constant 0 : index
    %c0_4 = arith.constant 0 : index
    %4 = vector.load %arg3[%c0_2, %c0_3, %c0_4] : memref<1x8x32xf32, #tpu.memory_space<vmem>>, vector<1x8x32xf32>
    %5 = vector.shape_cast %4 : vector<1x8x32xf32> to vector<8x32xf32>
    %6 = arith.addf %3, %5 : vector<8x32xf32>
    %7 = arith.truncf %6 : vector<8x32xf32> to vector<8x32xbf16>
    %c0_5 = arith.constant 0 : index
    %c0_6 = arith.constant 0 : index
    %c0_7 = arith.constant 0 : index
    %8 = vector.load %arg4[%c0_5, %c0_6, %c0_7] : memref<1x32x64xbf16, #tpu.memory_space<vmem>>, vector<1x32x64xbf16>
    %9 = vector.shape_cast %8 : vector<1x32x64xbf16> to vector<32x64xbf16>
    %cst = arith.constant dense<0.000000e+00> : vector<8x64xf32>
    %10 = tpu.matmul %7, %9, %cst {dimension_numbers = #tpu.dot_dimension_numbers<[1], [0], [0], [1], [0, 0, 1, 1], [], []>} : vector<8x32xbf16>, vector<32x64xbf16>, vector<8x64xf32> -> vector<8x64xf32>
    %c0_8 = arith.constant 0 : index
    %c0_9 = arith.constant 0 : index
    %c0_10 = arith.constant 0 : index
    %11 = vector.load %arg5[%c0_8, %c0_9, %c0_10] : memref<1x1x64xf32, #tpu.memory_space<vmem>>, vector<1x1x64xf32>
    %12 = vector.shape_cast %11 : vector<1x1x64xf32> to vector<1x64xf32>
    %13 = vector.broadcast %12 : vector<1x64xf32> to vector<8x64xf32>
    %14 = arith.addf %10, %13 : vector<8x64xf32>
    %15 = arith.truncf %3 : vector<8x32xf32> to vector<8x32xbf16>
    %c0_11 = arith.constant 0 : index
    %c0_12 = arith.constant 0 : index
    %c0_13 = arith.constant 0 : index
    %16 = vector.load %arg6[%c0_11, %c0_12, %c0_13] : memref<1x32x32xbf16, #tpu.memory_space<vmem>>, vector<1x32x32xbf16>
    %17 = vector.shape_cast %16 : vector<1x32x32xbf16> to vector<32x32xbf16>
    %cst_14 = arith.constant dense<0.000000e+00> : vector<8x32xf32>
    %18 = tpu.matmul %15, %17, %cst_14 {dimension_numbers = #tpu.dot_dimension_numbers<[1], [0], [0], [1], [0, 0, 1, 1], [], []>} : vector<8x32xbf16>, vector<32x32xbf16>, vector<8x32xf32> -> vector<8x32xf32>
    %c0_15 = arith.constant 0 : index
    %c0_16 = arith.constant 0 : index
    %c0_17 = arith.constant 0 : index
    %19 = vector.load %arg7[%c0_15, %c0_16, %c0_17] : memref<1x1x32xf32, #tpu.memory_space<vmem>>, vector<1x1x32xf32>
    %20 = vector.shape_cast %19 : vector<1x1x32xf32> to vector<1x32xf32>
    %21 = vector.broadcast %20 : vector<1x32xf32> to vector<8x32xf32>
    %22 = arith.addf %18, %21 : vector<8x32xf32>
    %23 = vector.extract_strided_slice %14 {offsets = [0, 0], sizes = [8, 32], strides = [1, 1]} : vector<8x64xf32> to vector<8x32xf32>
    %cst_18 = arith.constant 0.353553385 : f32
    %24 = vector.broadcast %cst_18 : f32 to vector<8x32xf32>
    %25 = arith.mulf %23, %24 : vector<8x32xf32>
    %26 = arith.truncf %25 : vector<8x32xf32> to vector<8x32xbf16>
    %27 = vector.extract_strided_slice %14 {offsets = [0, 32], sizes = [8, 32], strides = [1, 1]} : vector<8x64xf32> to vector<8x32xf32>
    %28 = arith.truncf %27 : vector<8x32xf32> to vector<8x32xbf16>
    %29 = arith.truncf %22 : vector<8x32xf32> to vector<8x32xbf16>
    %30 = vector.extract_strided_slice %26 {offsets = [0, 0], sizes = [8, 8], strides = [1, 1]} : vector<8x32xbf16> to vector<8x8xbf16>
    %31 = vector.extract_strided_slice %28 {offsets = [0, 0], sizes = [8, 8], strides = [1, 1]} : vector<8x32xbf16> to vector<8x8xbf16>
    %32 = vector.extract_strided_slice %29 {offsets = [0, 0], sizes = [8, 8], strides = [1, 1]} : vector<8x32xbf16> to vector<8x8xbf16>
    %cst_19 = arith.constant dense<0.000000e+00> : vector<8x8xf32>
    %33 = tpu.matmul %30, %31, %cst_19 {dimension_numbers = #tpu.dot_dimension_numbers<[1], [1], [0], [0], [0, 0, 1, 0], [], []>} : vector<8x8xbf16>, vector<8x8xbf16>, vector<8x8xf32> -> vector<8x8xf32>
    %cst_20 = arith.constant dense<0xFF800000> : vector<8xf32>
    %34 = vector.multi_reduction <maximumf>, %33, %cst_20 [1] : vector<8x8xf32> to vector<8xf32>
    %35 = vector.shape_cast %34 : vector<8xf32> to vector<8x1xf32>
    %36 = vector.broadcast %35 : vector<8x1xf32> to vector<8x8xf32>
    %37 = arith.subf %33, %36 : vector<8x8xf32>
    %38 = math.exp %37 : vector<8x8xf32>
    %cst_21 = arith.constant dense<0.000000e+00> : vector<8xf32>
    %39 = vector.multi_reduction <add>, %38, %cst_21 [1] : vector<8x8xf32> to vector<8xf32>
    %40 = vector.shape_cast %39 : vector<8xf32> to vector<8x1xf32>
    %41 = tpu.reciprocal %40 {approx = true} : vector<8x1xf32> -> vector<8x1xf32>
    %42 = vector.broadcast %41 : vector<8x1xf32> to vector<8x8xf32>
    %43 = arith.mulf %38, %42 : vector<8x8xf32>
    %44 = arith.truncf %43 : vector<8x8xf32> to vector<8x8xbf16>
    %cst_22 = arith.constant dense<0.000000e+00> : vector<8x8xf32>
    %45 = tpu.matmul %44, %32, %cst_22 {dimension_numbers = #tpu.dot_dimension_numbers<[1], [0], [0], [1], [0, 0, 1, 1], [], []>} : vector<8x8xbf16>, vector<8x8xbf16>, vector<8x8xf32> -> vector<8x8xf32>
    %46 = arith.truncf %45 : vector<8x8xf32> to vector<8x8xbf16>
    %c0_23 = arith.constant 0 : index
    %c0_24 = arith.constant 0 : index
    %47 = vector.load %arg22[%c0_23, %c0_24] : memref<8x32xbf16, #tpu.memory_space<vmem>>, vector<8x8xbf16>
    tpu.vector_store %arg22[%c0_23, %c0_24], %46 {strides = array<i32>} : memref<8x32xbf16, #tpu.memory_space<vmem>>, vector<8x8xbf16>,
    %48 = vector.extract_strided_slice %26 {offsets = [0, 8], sizes = [8, 8], strides = [1, 1]} : vector<8x32xbf16> to vector<8x8xbf16>
    %49 = vector.extract_strided_slice %28 {offsets = [0, 8], sizes = [8, 8], strides = [1, 1]} : vector<8x32xbf16> to vector<8x8xbf16>
    %50 = vector.extract_strided_slice %29 {offsets = [0, 8], sizes = [8, 8], strides = [1, 1]} : vector<8x32xbf16> to vector<8x8xbf16>
    %cst_25 = arith.constant dense<0.000000e+00> : vector<8x8xf32>
    %51 = tpu.matmul %48, %49, %cst_25 {dimension_numbers = #tpu.dot_dimension_numbers<[1], [1], [0], [0], [0, 0, 1, 0], [], []>} : vector<8x8xbf16>, vector<8x8xbf16>, vector<8x8xf32> -> vector<8x8xf32>
    %cst_26 = arith.constant dense<0xFF800000> : vector<8xf32>
    %52 = vector.multi_reduction <maximumf>, %51, %cst_26 [1] : vector<8x8xf32> to vector<8xf32>
    %53 = vector.shape_cast %52 : vector<8xf32> to vector<8x1xf32>
    %54 = vector.broadcast %53 : vector<8x1xf32> to vector<8x8xf32>
    %55 = arith.subf %51, %54 : vector<8x8xf32>
    %56 = math.exp %55 : vector<8x8xf32>
    %cst_27 = arith.constant dense<0.000000e+00> : vector<8xf32>
    %57 = vector.multi_reduction <add>, %56, %cst_27 [1] : vector<8x8xf32> to vector<8xf32>
    %58 = vector.shape_cast %57 : vector<8xf32> to vector<8x1xf32>
    %59 = tpu.reciprocal %58 {approx = true} : vector<8x1xf32> -> vector<8x1xf32>
    %60 = vector.broadcast %59 : vector<8x1xf32> to vector<8x8xf32>
    %61 = arith.mulf %56, %60 : vector<8x8xf32>
    %62 = arith.truncf %61 : vector<8x8xf32> to vector<8x8xbf16>
    %cst_28 = arith.constant dense<0.000000e+00> : vector<8x8xf32>
    %63 = tpu.matmul %62, %50, %cst_28 {dimension_numbers = #tpu.dot_dimension_numbers<[1], [0], [0], [1], [0, 0, 1, 1], [], []>} : vector<8x8xbf16>, vector<8x8xbf16>, vector<8x8xf32> -> vector<8x8xf32>
    %64 = arith.truncf %63 : vector<8x8xf32> to vector<8x8xbf16>
    %c0_29 = arith.constant 0 : index
    %c8 = arith.constant 8 : index
    %65 = vector.load %arg22[%c0_29, %c8] : memref<8x32xbf16, #tpu.memory_space<vmem>>, vector<8x8xbf16>
    tpu.vector_store %arg22[%c0_29, %c8], %64 {strides = array<i32>} : memref<8x32xbf16, #tpu.memory_space<vmem>>, vector<8x8xbf16>,
    %66 = vector.extract_strided_slice %26 {offsets = [0, 16], sizes = [8, 8], strides = [1, 1]} : vector<8x32xbf16> to vector<8x8xbf16>
    %67 = vector.extract_strided_slice %28 {offsets = [0, 16], sizes = [8, 8], strides = [1, 1]} : vector<8x32xbf16> to vector<8x8xbf16>
    %68 = vector.extract_strided_slice %29 {offsets = [0, 16], sizes = [8, 8], strides = [1, 1]} : vector<8x32xbf16> to vector<8x8xbf16>
    %cst_30 = arith.constant dense<0.000000e+00> : vector<8x8xf32>
    %69 = tpu.matmul %66, %67, %cst_30 {dimension_numbers = #tpu.dot_dimension_numbers<[1], [1], [0], [0], [0, 0, 1, 0], [], []>} : vector<8x8xbf16>, vector<8x8xbf16>, vector<8x8xf32> -> vector<8x8xf32>
    %cst_31 = arith.constant dense<0xFF800000> : vector<8xf32>
    %70 = vector.multi_reduction <maximumf>, %69, %cst_31 [1] : vector<8x8xf32> to vector<8xf32>
    %71 = vector.shape_cast %70 : vector<8xf32> to vector<8x1xf32>
    %72 = vector.broadcast %71 : vector<8x1xf32> to vector<8x8xf32>
    %73 = arith.subf %69, %72 : vector<8x8xf32>
    %74 = math.exp %73 : vector<8x8xf32>
    %cst_32 = arith.constant dense<0.000000e+00> : vector<8xf32>
    %75 = vector.multi_reduction <add>, %74, %cst_32 [1] : vector<8x8xf32> to vector<8xf32>
    %76 = vector.shape_cast %75 : vector<8xf32> to vector<8x1xf32>
    %77 = tpu.reciprocal %76 {approx = true} : vector<8x1xf32> -> vector<8x1xf32>
    %78 = vector.broadcast %77 : vector<8x1xf32> to vector<8x8xf32>
    %79 = arith.mulf %74, %78 : vector<8x8xf32>
    %80 = arith.truncf %79 : vector<8x8xf32> to vector<8x8xbf16>
    %cst_33 = arith.constant dense<0.000000e+00> : vector<8x8xf32>
    %81 = tpu.matmul %80, %68, %cst_33 {dimension_numbers = #tpu.dot_dimension_numbers<[1], [0], [0], [1], [0, 0, 1, 1], [], []>} : vector<8x8xbf16>, vector<8x8xbf16>, vector<8x8xf32> -> vector<8x8xf32>
    %82 = arith.truncf %81 : vector<8x8xf32> to vector<8x8xbf16>
    %c0_34 = arith.constant 0 : index
    %c16 = arith.constant 16 : index
    %83 = vector.load %arg22[%c0_34, %c16] : memref<8x32xbf16, #tpu.memory_space<vmem>>, vector<8x8xbf16>
    tpu.vector_store %arg22[%c0_34, %c16], %82 {strides = array<i32>} : memref<8x32xbf16, #tpu.memory_space<vmem>>, vector<8x8xbf16>,
    %84 = vector.extract_strided_slice %26 {offsets = [0, 24], sizes = [8, 8], strides = [1, 1]} : vector<8x32xbf16> to vector<8x8xbf16>
    %85 = vector.extract_strided_slice %28 {offsets = [0, 24], sizes = [8, 8], strides = [1, 1]} : vector<8x32xbf16> to vector<8x8xbf16>
    %86 = vector.extract_strided_slice %29 {offsets = [0, 24], sizes = [8, 8], strides = [1, 1]} : vector<8x32xbf16> to vector<8x8xbf16>
    %cst_35 = arith.constant dense<0.000000e+00> : vector<8x8xf32>
    %87 = tpu.matmul %84, %85, %cst_35 {dimension_numbers = #tpu.dot_dimension_numbers<[1], [1], [0], [0], [0, 0, 1, 0], [], []>} : vector<8x8xbf16>, vector<8x8xbf16>, vector<8x8xf32> -> vector<8x8xf32>
    %cst_36 = arith.constant dense<0xFF800000> : vector<8xf32>
    %88 = vector.multi_reduction <maximumf>, %87, %cst_36 [1] : vector<8x8xf32> to vector<8xf32>
    %89 = vector.shape_cast %88 : vector<8xf32> to vector<8x1xf32>
    %90 = vector.broadcast %89 : vector<8x1xf32> to vector<8x8xf32>
    %91 = arith.subf %87, %90 : vector<8x8xf32>
    %92 = math.exp %91 : vector<8x8xf32>
    %cst_37 = arith.constant dense<0.000000e+00> : vector<8xf32>
    %93 = vector.multi_reduction <add>, %92, %cst_37 [1] : vector<8x8xf32> to vector<8xf32>
    %94 = vector.shape_cast %93 : vector<8xf32> to vector<8x1xf32>
    %95 = tpu.reciprocal %94 {approx = true} : vector<8x1xf32> -> vector<8x1xf32>
    %96 = vector.broadcast %95 : vector<8x1xf32> to vector<8x8xf32>
    %97 = arith.mulf %92, %96 : vector<8x8xf32>
    %98 = arith.truncf %97 : vector<8x8xf32> to vector<8x8xbf16>
    %cst_38 = arith.constant dense<0.000000e+00> : vector<8x8xf32>
    %99 = tpu.matmul %98, %86, %cst_38 {dimension_numbers = #tpu.dot_dimension_numbers<[1], [0], [0], [1], [0, 0, 1, 1], [], []>} : vector<8x8xbf16>, vector<8x8xbf16>, vector<8x8xf32> -> vector<8x8xf32>
    %100 = arith.truncf %99 : vector<8x8xf32> to vector<8x8xbf16>
    %c0_39 = arith.constant 0 : index
    %c24 = arith.constant 24 : index
    %101 = vector.load %arg22[%c0_39, %c24] : memref<8x32xbf16, #tpu.memory_space<vmem>>, vector<8x8xbf16>
    tpu.vector_store %arg22[%c0_39, %c24], %100 {strides = array<i32>} : memref<8x32xbf16, #tpu.memory_space<vmem>>, vector<8x8xbf16>,
    %c0_40 = arith.constant 0 : index
    %c0_41 = arith.constant 0 : index
    %102 = vector.load %arg22[%c0_40, %c0_41] : memref<8x32xbf16, #tpu.memory_space<vmem>>, vector<8x32xbf16>
    %c0_42 = arith.constant 0 : index
    %c0_43 = arith.constant 0 : index
    %c0_44 = arith.constant 0 : index
    %103 = vector.load %arg8[%c0_42, %c0_43, %c0_44] : memref<1x32x32xbf16, #tpu.memory_space<vmem>>, vector<1x32x32xbf16>
    %104 = vector.shape_cast %103 : vector<1x32x32xbf16> to vector<32x32xbf16>
    %cst_45 = arith.constant dense<0.000000e+00> : vector<8x32xf32>
    %105 = tpu.matmul %102, %104, %cst_45 {dimension_numbers = #tpu.dot_dimension_numbers<[1], [0], [0], [1], [0, 0, 1, 1], [], []>} : vector<8x32xbf16>, vector<32x32xbf16>, vector<8x32xf32> -> vector<8x32xf32>
    %c0_46 = arith.constant 0 : index
    %c0_47 = arith.constant 0 : index
    %c0_48 = arith.constant 0 : index
    %106 = vector.load %arg9[%c0_46, %c0_47, %c0_48] : memref<1x1x32xf32, #tpu.memory_space<vmem>>, vector<1x1x32xf32>
    %107 = vector.shape_cast %106 : vector<1x1x32xf32> to vector<1x32xf32>
    %108 = vector.broadcast %107 : vector<1x32xf32> to vector<8x32xf32>
    %109 = arith.addf %105, %108 : vector<8x32xf32>
    %110 = arith.addf %3, %109 : vector<8x32xf32>
    %c0_49 = arith.constant 0 : index
    %c0_50 = arith.constant 0 : index
    %c0_51 = arith.constant 0 : index
    %111 = vector.load %arg10[%c0_49, %c0_50, %c0_51] : memref<1x1x32xf32, #tpu.memory_space<vmem>>, vector<1x1x32xf32>
    %112 = vector.shape_cast %111 : vector<1x1x32xf32> to vector<1x32xf32>
    %c0_52 = arith.constant 0 : index
    %c0_53 = arith.constant 0 : index
    %c0_54 = arith.constant 0 : index
    %113 = vector.load %arg11[%c0_52, %c0_53, %c0_54] : memref<1x1x32xf32, #tpu.memory_space<vmem>>, vector<1x1x32xf32>
    %114 = vector.shape_cast %113 : vector<1x1x32xf32> to vector<1x32xf32>
    %cst_55 = arith.constant dense<0.000000e+00> : vector<8xf32>
    %115 = vector.multi_reduction <add>, %110, %cst_55 [1] : vector<8x32xf32> to vector<8xf32>
    %116 = vector.shape_cast %115 : vector<8xf32> to vector<8x1xf32>
    %cst_56 = arith.constant 3.200000e+01 : f32
    %117 = vector.broadcast %cst_56 : f32 to vector<8x1xf32>
    %118 = arith.divf %116, %117 : vector<8x1xf32>
    %119 = vector.broadcast %118 : vector<8x1xf32> to vector<8x32xf32>
    %120 = arith.subf %110, %119 : vector<8x32xf32>
    %121 = arith.mulf %120, %120 : vector<8x32xf32>
    %cst_57 = arith.constant dense<0.000000e+00> : vector<8xf32>
    %122 = vector.multi_reduction <add>, %121, %cst_57 [1] : vector<8x32xf32> to vector<8xf32>
    %123 = vector.shape_cast %122 : vector<8xf32> to vector<8x1xf32>
    %cst_58 = arith.constant 3.200000e+01 : f32
    %124 = vector.broadcast %cst_58 : f32 to vector<8x1xf32>
    %125 = arith.divf %123, %124 : vector<8x1xf32>
    %126 = vector.broadcast %118 : vector<8x1xf32> to vector<8x32xf32>
    %127 = arith.subf %110, %126 : vector<8x32xf32>
    %cst_59 = arith.constant 9.99999974E-6 : f32
    %128 = vector.broadcast %cst_59 : f32 to vector<8x1xf32>
    %129 = arith.addf %125, %128 : vector<8x1xf32>
    %130 = math.rsqrt %129 : vector<8x1xf32>
    %131 = vector.broadcast %130 : vector<8x1xf32> to vector<8x32xf32>
    %132 = arith.mulf %127, %131 : vector<8x32xf32>
    %133 = vector.broadcast %112 : vector<1x32xf32> to vector<8x32xf32>
    %134 = arith.mulf %132, %133 : vector<8x32xf32>
    %135 = vector.broadcast %114 : vector<1x32xf32> to vector<8x32xf32>
    %136 = arith.addf %134, %135 : vector<8x32xf32>
    %137 = arith.truncf %136 : vector<8x32xf32> to vector<8x32xbf16>
    %c0_60 = arith.constant 0 : index
    %c0_61 = arith.constant 0 : index
    %c0_62 = arith.constant 0 : index
    %138 = vector.load %arg12[%c0_60, %c0_61, %c0_62] : memref<1x32x64xbf16, #tpu.memory_space<vmem>>, vector<1x32x64xbf16>
    %139 = vector.shape_cast %138 : vector<1x32x64xbf16> to vector<32x64xbf16>
    %cst_63 = arith.constant dense<0.000000e+00> : vector<8x64xf32>
    %140 = tpu.matmul %137, %139, %cst_63 {dimension_numbers = #tpu.dot_dimension_numbers<[1], [0], [0], [1], [0, 0, 1, 1], [], []>} : vector<8x32xbf16>, vector<32x64xbf16>, vector<8x64xf32> -> vector<8x64xf32>
    %c0_64 = arith.constant 0 : index
    %c0_65 = arith.constant 0 : index
    %c0_66 = arith.constant 0 : index
    %141 = vector.load %arg13[%c0_64, %c0_65, %c0_66] : memref<1x1x64xf32, #tpu.memory_space<vmem>>, vector<1x1x64xf32>
    %142 = vector.shape_cast %141 : vector<1x1x64xf32> to vector<1x64xf32>
    %143 = vector.broadcast %142 : vector<1x64xf32> to vector<8x64xf32>
    %144 = arith.addf %140, %143 : vector<8x64xf32>
    %cst_67 = arith.constant 0.000000e+00 : f32
    %145 = vector.broadcast %cst_67 : f32 to vector<8x64xf32>
    %146 = arith.maximumf %144, %145 : vector<8x64xf32>
    %147 = arith.truncf %146 : vector<8x64xf32> to vector<8x64xbf16>
    %c0_68 = arith.constant 0 : index
    %c0_69 = arith.constant 0 : index
    %c0_70 = arith.constant 0 : index
    %148 = vector.load %arg14[%c0_68, %c0_69, %c0_70] : memref<1x64x32xbf16, #tpu.memory_space<vmem>>, vector<1x64x32xbf16>
    %149 = vector.shape_cast %148 : vector<1x64x32xbf16> to vector<64x32xbf16>
    %cst_71 = arith.constant dense<0.000000e+00> : vector<8x32xf32>
    %150 = tpu.matmul %147, %149, %cst_71 {dimension_numbers = #tpu.dot_dimension_numbers<[1], [0], [0], [1], [0, 0, 1, 1], [], []>} : vector<8x64xbf16>, vector<64x32xbf16>, vector<8x32xf32> -> vector<8x32xf32>
    %c0_72 = arith.constant 0 : index
    %c0_73 = arith.constant 0 : index
    %c0_74 = arith.constant 0 : index
    %151 = vector.load %arg15[%c0_72, %c0_73, %c0_74] : memref<1x1x32xf32, #tpu.memory_space<vmem>>, vector<1x1x32xf32>
    %152 = vector.shape_cast %151 : vector<1x1x32xf32> to vector<1x32xf32>
    %153 = vector.broadcast %152 : vector<1x32xf32> to vector<8x32xf32>
    %154 = arith.addf %150, %153 : vector<8x32xf32>
    %155 = arith.addf %136, %154 : vector<8x32xf32>
    %c0_75 = arith.constant 0 : index
    %c0_76 = arith.constant 0 : index
    %c0_77 = arith.constant 0 : index
    %156 = vector.load %arg16[%c0_75, %c0_76, %c0_77] : memref<1x1x32xf32, #tpu.memory_space<vmem>>, vector<1x1x32xf32>
    %157 = vector.shape_cast %156 : vector<1x1x32xf32> to vector<1x32xf32>
    %c0_78 = arith.constant 0 : index
    %c0_79 = arith.constant 0 : index
    %c0_80 = arith.constant 0 : index
    %158 = vector.load %arg17[%c0_78, %c0_79, %c0_80] : memref<1x1x32xf32, #tpu.memory_space<vmem>>, vector<1x1x32xf32>
    %159 = vector.shape_cast %158 : vector<1x1x32xf32> to vector<1x32xf32>
    %cst_81 = arith.constant dense<0.000000e+00> : vector<8xf32>
    %160 = vector.multi_reduction <add>, %155, %cst_81 [1] : vector<8x32xf32> to vector<8xf32>
    %161 = vector.shape_cast %160 : vector<8xf32> to vector<8x1xf32>
    %cst_82 = arith.constant 3.200000e+01 : f32
    %162 = vector.broadcast %cst_82 : f32 to vector<8x1xf32>
    %163 = arith.divf %161, %162 : vector<8x1xf32>
    %164 = vector.broadcast %163 : vector<8x1xf32> to vector<8x32xf32>
    %165 = arith.subf %155, %164 : vector<8x32xf32>
    %166 = arith.mulf %165, %165 : vector<8x32xf32>
    %cst_83 = arith.constant dense<0.000000e+00> : vector<8xf32>
    %167 = vector.multi_reduction <add>, %166, %cst_83 [1] : vector<8x32xf32> to vector<8xf32>
    %168 = vector.shape_cast %167 : vector<8xf32> to vector<8x1xf32>
    %cst_84 = arith.constant 3.200000e+01 : f32
    %169 = vector.broadcast %cst_84 : f32 to vector<8x1xf32>
    %170 = arith.divf %168, %169 : vector<8x1xf32>
    %171 = vector.broadcast %163 : vector<8x1xf32> to vector<8x32xf32>
    %172 = arith.subf %155, %171 : vector<8x32xf32>
    %cst_85 = arith.constant 9.99999974E-6 : f32
    %173 = vector.broadcast %cst_85 : f32 to vector<8x1xf32>
    %174 = arith.addf %170, %173 : vector<8x1xf32>
    %175 = math.rsqrt %174 : vector<8x1xf32>
    %176 = vector.broadcast %175 : vector<8x1xf32> to vector<8x32xf32>
    %177 = arith.mulf %172, %176 : vector<8x32xf32>
    %178 = vector.broadcast %157 : vector<1x32xf32> to vector<8x32xf32>
    %179 = arith.mulf %177, %178 : vector<8x32xf32>
    %180 = vector.broadcast %159 : vector<1x32xf32> to vector<8x32xf32>
    %181 = arith.addf %179, %180 : vector<8x32xf32>
    %c0_86 = arith.constant 0 : index
    %c0_87 = arith.constant 0 : index
    %182 = vector.load %arg21[%c0_86, %c0_87] : memref<8x32xf32, #tpu.memory_space<vmem>>, vector<8x32xf32>
    tpu.vector_store %arg21[%c0_86, %c0_87], %181 {strides = array<i32>} : memref<8x32xf32, #tpu.memory_space<vmem>>, vector<8x32xf32>,
    %c1_i32 = arith.constant 1 : i32
    %183 = arith.cmpi eq, %arg1, %c1_i32 : i32
    %184 = arith.extui %183 : i1 to i32
    %c0_i32_88 = arith.constant 0 : i32
    %185 = arith.cmpi ne, %184, %c0_i32_88 : i32
    scf.if %185 {
      %c0_89 = arith.constant 0 : index
      %c0_90 = arith.constant 0 : index
      %186 = vector.load %arg21[%c0_89, %c0_90] : memref<8x32xf32, #tpu.memory_space<vmem>>, vector<8x32xf32>
      %c0_91 = arith.constant 0 : index
      %c0_92 = arith.constant 0 : index
      %187 = vector.load %arg18[%c0_91, %c0_92] : memref<1x32xf32, #tpu.memory_space<vmem>>, vector<1x32xf32>
      %c0_93 = arith.constant 0 : index
      %c0_94 = arith.constant 0 : index
      %188 = vector.load %arg19[%c0_93, %c0_94] : memref<1x32xf32, #tpu.memory_space<vmem>>, vector<1x32xf32>
      %cst_95 = arith.constant dense<0.000000e+00> : vector<8xf32>
      %189 = vector.multi_reduction <add>, %186, %cst_95 [1] : vector<8x32xf32> to vector<8xf32>
      %190 = vector.shape_cast %189 : vector<8xf32> to vector<8x1xf32>
      %cst_96 = arith.constant 3.200000e+01 : f32
      %191 = vector.broadcast %cst_96 : f32 to vector<8x1xf32>
      %192 = arith.divf %190, %191 : vector<8x1xf32>
      %193 = vector.broadcast %192 : vector<8x1xf32> to vector<8x32xf32>
      %194 = arith.subf %186, %193 : vector<8x32xf32>
      %195 = arith.mulf %194, %194 : vector<8x32xf32>
      %cst_97 = arith.constant dense<0.000000e+00> : vector<8xf32>
      %196 = vector.multi_reduction <add>, %195, %cst_97 [1] : vector<8x32xf32> to vector<8xf32>
      %197 = vector.shape_cast %196 : vector<8xf32> to vector<8x1xf32>
      %cst_98 = arith.constant 3.200000e+01 : f32
      %198 = vector.broadcast %cst_98 : f32 to vector<8x1xf32>
      %199 = arith.divf %197, %198 : vector<8x1xf32>
      %200 = vector.broadcast %192 : vector<8x1xf32> to vector<8x32xf32>
      %201 = arith.subf %186, %200 : vector<8x32xf32>
      %cst_99 = arith.constant 9.99999974E-6 : f32
      %202 = vector.broadcast %cst_99 : f32 to vector<8x1xf32>
      %203 = arith.addf %199, %202 : vector<8x1xf32>
      %204 = math.rsqrt %203 : vector<8x1xf32>
      %205 = vector.broadcast %204 : vector<8x1xf32> to vector<8x32xf32>
      %206 = arith.mulf %201, %205 : vector<8x32xf32>
      %207 = vector.broadcast %187 : vector<1x32xf32> to vector<8x32xf32>
      %208 = arith.mulf %206, %207 : vector<8x32xf32>
      %209 = vector.broadcast %188 : vector<1x32xf32> to vector<8x32xf32>
      %210 = arith.addf %208, %209 : vector<8x32xf32>
      %c0_100 = arith.constant 0 : index
      %c0_101 = arith.constant 0 : index
      %c0_102 = arith.constant 0 : index
      %211 = vector.load %arg20[%c0_100, %c0_101, %c0_102] : memref<1x8x32xf32, #tpu.memory_space<vmem>>, vector<1x8x32xf32>
      %212 = vector.shape_cast %211 : vector<1x8x32xf32> to vector<8x32xf32>
      %213 = vector.shape_cast %210 : vector<8x32xf32> to vector<1x8x32xf32>
      tpu.vector_store %arg20[%c0_100, %c0_101, %c0_102], %213 {strides = array<i32>} : memref<1x8x32xf32, #tpu.memory_space<vmem>>, vector<1x8x32xf32>,
    } else {
    }
    return
  }
  func.func @transform_0(%arg0: i32, %arg1: i32) -> (i32, i32, i32) {
    %c0_i32 = arith.constant 0 : i32
    %c0_i32_0 = arith.constant 0 : i32
    %c0_i32_1 = arith.constant 0 : i32
    return %arg0, %c0_i32, %c0_i32_0 : i32, i32, i32
  }
  func.func @transform_1(%arg0: i32, %arg1: i32) -> (i32, i32, i32) {
    %c0_i32 = arith.constant 0 : i32
    %c0_i32_0 = arith.constant 0 : i32
    %c0_i32_1 = arith.constant 0 : i32
    return %arg0, %c0_i32, %c0_i32_0 : i32, i32, i32
  }
  func.func @transform_2(%arg0: i32, %arg1: i32) -> (i32, i32, i32) {
    %c0_i32 = arith.constant 0 : i32
    %c0_i32_0 = arith.constant 0 : i32
    %c0_i32_1 = arith.constant 0 : i32
    %c0_i32_2 = arith.constant 0 : i32
    return %c0_i32, %c0_i32_0, %c0_i32_1 : i32, i32, i32
  }
  func.func @transform_3(%arg0: i32, %arg1: i32) -> (i32, i32, i32) {
    %c0_i32 = arith.constant 0 : i32
    %c0_i32_0 = arith.constant 0 : i32
    %c0_i32_1 = arith.constant 0 : i32
    %c0_i32_2 = arith.constant 0 : i32
    return %c0_i32, %c0_i32_0, %c0_i32_1 : i32, i32, i32
  }
  func.func @transform_4(%arg0: i32, %arg1: i32) -> (i32, i32, i32) {
    %c0_i32 = arith.constant 0 : i32
    %c0_i32_0 = arith.constant 0 : i32
    %c0_i32_1 = arith.constant 0 : i32
    %c0_i32_2 = arith.constant 0 : i32
    return %c0_i32, %c0_i32_0, %c0_i32_1 : i32, i32, i32
  }
  func.func @transform_5(%arg0: i32, %arg1: i32) -> (i32, i32, i32) {
    %c0_i32 = arith.constant 0 : i32
    %c0_i32_0 = arith.constant 0 : i32
    %c0_i32_1 = arith.constant 0 : i32
    %c0_i32_2 = arith.constant 0 : i32
    return %c0_i32, %c0_i32_0, %c0_i32_1 : i32, i32, i32
  }
  func.func @transform_6(%arg0: i32, %arg1: i32) -> (i32, i32, i32) {
    %c0_i32 = arith.constant 0 : i32
    %c0_i32_0 = arith.constant 0 : i32
    %c0_i32_1 = arith.constant 0 : i32
    %c0_i32_2 = arith.constant 0 : i32
    return %c0_i32, %c0_i32_0, %c0_i32_1 : i32, i32, i32
  }
  func.func @transform_7(%arg0: i32, %arg1: i32) -> (i32, i32, i32) {
    %c0_i32 = arith.constant 0 : i32
    %c0_i32_0 = arith.constant 0 : i32
    %c0_i32_1 = arith.constant 0 : i32
    %c0_i32_2 = arith.constant 0 : i32
    return %c0_i32, %c0_i32_0, %c0_i32_1 : i32, i32, i32
  }
  func.func @transform_8(%arg0: i32, %arg1: i32) -> (i32, i32, i32) {
    %c0_i32 = arith.constant 0 : i32
    %c0_i32_0 = arith.constant 0 : i32
    %c0_i32_1 = arith.constant 0 : i32
    %c0_i32_2 = arith.constant 0 : i32
    return %c0_i32, %c0_i32_0, %c0_i32_1 : i32, i32, i32
  }
  func.func @transform_9(%arg0: i32, %arg1: i32) -> (i32, i32, i32) {
    %c0_i32 = arith.constant 0 : i32
    %c0_i32_0 = arith.constant 0 : i32
    %c0_i32_1 = arith.constant 0 : i32
    %c0_i32_2 = arith.constant 0 : i32
    return %c0_i32, %c0_i32_0, %c0_i32_1 : i32, i32, i32
  }
  func.func @transform_10(%arg0: i32, %arg1: i32) -> (i32, i32, i32) {
    %c0_i32 = arith.constant 0 : i32
    %c0_i32_0 = arith.constant 0 : i32
    %c0_i32_1 = arith.constant 0 : i32
    %c0_i32_2 = arith.constant 0 : i32
    return %c0_i32, %c0_i32_0, %c0_i32_1 : i32, i32, i32
  }
  func.func @transform_11(%arg0: i32, %arg1: i32) -> (i32, i32, i32) {
    %c0_i32 = arith.constant 0 : i32
    %c0_i32_0 = arith.constant 0 : i32
    %c0_i32_1 = arith.constant 0 : i32
    %c0_i32_2 = arith.constant 0 : i32
    return %c0_i32, %c0_i32_0, %c0_i32_1 : i32, i32, i32
  }
  func.func @transform_12(%arg0: i32, %arg1: i32) -> (i32, i32, i32) {
    %c0_i32 = arith.constant 0 : i32
    %c0_i32_0 = arith.constant 0 : i32
    %c0_i32_1 = arith.constant 0 : i32
    %c0_i32_2 = arith.constant 0 : i32
    return %c0_i32, %c0_i32_0, %c0_i32_1 : i32, i32, i32
  }
  func.func @transform_13(%arg0: i32, %arg1: i32) -> (i32, i32, i32) {
    %c0_i32 = arith.constant 0 : i32
    %c0_i32_0 = arith.constant 0 : i32
    %c0_i32_1 = arith.constant 0 : i32
    %c0_i32_2 = arith.constant 0 : i32
    return %c0_i32, %c0_i32_0, %c0_i32_1 : i32, i32, i32
  }
  func.func @transform_14(%arg0: i32, %arg1: i32) -> (i32, i32, i32) {
    %c0_i32 = arith.constant 0 : i32
    %c0_i32_0 = arith.constant 0 : i32
    %c0_i32_1 = arith.constant 0 : i32
    %c0_i32_2 = arith.constant 0 : i32
    return %c0_i32, %c0_i32_0, %c0_i32_1 : i32, i32, i32
  }
  func.func @transform_15(%arg0: i32, %arg1: i32) -> (i32, i32, i32) {
    %c0_i32 = arith.constant 0 : i32
    %c0_i32_0 = arith.constant 0 : i32
    %c0_i32_1 = arith.constant 0 : i32
    %c0_i32_2 = arith.constant 0 : i32
    return %c0_i32, %c0_i32_0, %c0_i32_1 : i32, i32, i32
  }
  func.func @transform_16(%arg0: i32, %arg1: i32) -> (i32, i32) {
    %c0_i32 = arith.constant 0 : i32
    %c0_i32_0 = arith.constant 0 : i32
    %c0_i32_1 = arith.constant 0 : i32
    return %c0_i32, %c0_i32_0 : i32, i32
  }
  func.func @transform_17(%arg0: i32, %arg1: i32) -> (i32, i32) {
    %c0_i32 = arith.constant 0 : i32
    %c0_i32_0 = arith.constant 0 : i32
    %c0_i32_1 = arith.constant 0 : i32
    return %c0_i32, %c0_i32_0 : i32, i32
  }
  func.func @transform_18(%arg0: i32, %arg1: i32) -> (i32, i32, i32) {
    %c0_i32 = arith.constant 0 : i32
    %c0_i32_0 = arith.constant 0 : i32
    %c0_i32_1 = arith.constant 0 : i32
    return %arg0, %c0_i32, %c0_i32_0 : i32, i32, i32
  }
}

</mosaic_0001>

<bundles_post_ra>
// kernel: tpu_custom_call.1
= control target key start
LH: loop header
LB: loop body
LE: loop exit
PB: predicated region body
PF: predicated region fallthrough
CT: control target
= control target key end

     0   :  { %s2890_s0 = inlined_call_operand.vmem [shape: f32[2,8,32], index: 0, kind: input, shape index: {}]   ;;  %s2891_s1 = inlined_call_operand.vmem [shape: f32[2,8,32], index: 1, kind: input, shape index: {}]   ;;  %s2892_s2 = inlined_call_operand.vmem [shape: bf16[1,32,64], index: 2, kind: input, shape index: {}]   ;;  %s2893_s3 = inlined_call_operand.vmem [shape: f32[1,1,64], index: 3, kind: input, shape index: {}]   ;;  %s2894_s4 = inlined_call_operand.hbm [shape: bf16[1,32,32], index: 4, kind: input, shape index: {}]   ;;  %s2895_s5 = inlined_call_operand.vmem [shape: f32[1,1,32], index: 5, kind: input, shape index: {}]   ;;  %s2896_s6 = inlined_call_operand.hbm [shape: bf16[1,32,32], index: 6, kind: input, shape index: {}]   ;;  %s2897_s7 = inlined_call_operand.hbm [shape: f32[1,1,32], index: 7, kind: input, shape index: {}]   ;;  %s2898_s8 = inlined_call_operand.hbm [shape: f32[1,1,32], index: 8, kind: input, shape index: {}]   ;;  %s2899_s9 = inlined_call_operand.hbm [shape: f32[1,1,32], index: 9, kind: input, shape index: {}]   ;;  %s2900_s10 = inlined_call_operand.vmem [shape: bf16[1,32,64], index: 10, kind: input, shape index: {}]   ;;  %s2901_s11 = inlined_call_operand.vmem [shape: f32[1,1,64], index: 11, kind: input, shape index: {}]   ;;  %s2902_s12 = inlined_call_operand.vmem [shape: bf16[1,64,32], index: 12, kind: input, shape index: {}]   ;;  %s2903_s13 = inlined_call_operand.vmem [shape: f32[1,1,32], index: 13, kind: input, shape index: {}]   ;;  %s2904_s14 = inlined_call_operand.vmem [shape: f32[1,1,32], index: 14, kind: input, shape index: {}]   ;;  %s2905_s15 = inlined_call_operand.vmem [shape: f32[1,1,32], index: 15, kind: input, shape index: {}]   ;;  %s2906_s16 = inlined_call_operand.vmem [shape: f32[1,32], index: 16, kind: input, shape index: {}]   ;;  %s2907_s17 = inlined_call_operand.vmem [shape: f32[1,32], index: 17, kind: input, shape index: {}]   ;;  %s2908_s18 = inlined_call_operand.hbm [shape: f32[2,8,32], index: 18, kind: output, shape index: {}]  }
   0x1   :  { %2927 = sst [smem:[#allocation28_spill]] %s2890_s0 }
   0x2   :  { %2928 = sst [smem:[#allocation29_spill]] %s2891_s1 }
   0x3   :  { %2929 = sst [smem:[#allocation30_spill]] %s2892_s2 }
   0x4   :  { %2930 = sst [smem:[#allocation31_spill]] %s2904_s14 }
   0x5   :  { %2931 = sst [smem:[#allocation32_spill]] %s2905_s15 }
   0x6   :  { %2932 = sst [smem:[#allocation33_spill]] %s2906_s16 }
   0x7   :  { %2933 = sst [smem:[#allocation34_spill]] %s2907_s17 }
   0x8   :  { %2934 = sst [smem:[#allocation35_spill]] %s2908_s18 }
   0x9   :  { %23 = vsyncpa [#allocation5], 0 }
   0xa   :  { %24 = vsyncpa [#allocation8], 0 }
   0xb   :  { %25 = vsyncpa [#allocation11], 0 }
   0xc   :  { %26 = vsyncpa [#allocation6], 0 }
   0xd   :  { %28 = vsyncpa [#allocation6 + $0x1], 0  ;;  %s2474_s27 = smov 0   ;;  %s2476_s28 = smov 0  }
   0xe   :  { %s2478_s29 = smov 0   ;;  %s2480_s30 = smov 0  }
   0xf   :  { %s2482_s0 = smov 0   ;;  %s2484_s19 = smov 0  }
  0x10   :  { %s2486_s1 = smov 0   ;;  %s2488_s20 = smov 0  }
  0x11 LB: > { %2935 = sst [smem:[#allocation18_spill]] %s2329_s27  ;;  %s1750_s21 = sadd.s32 4294967295, %s2357_s20   ;;  %s2357_s20 = sphi %s2488_s20, %s34_s20   ;;  %s2353_s1 = sphi %s2486_s1, %s2975_s1   ;;  %s2349_s19 = sphi %s2484_s19, %s2974_s19   ;;  %s2345_s0 = sphi %s2482_s0, %s2973_s0   ;;  %s2341_s30 = sphi %s2480_s30, %s2972_s30   ;;  %s2337_s29 = sphi %s2478_s29, %s2971_s29   ;;  %s2333_s28 = sphi %s2476_s28, %s2977_s28   ;;  %s2329_s27 = sphi %s2474_s27, %s2976_s27  }
  0x12   : > { %2936 = sst [smem:[#allocation19_spill]] %s2337_s29  ;;  %s1751_s22 = sadd.s32 4294967294, %s2357_s20  }
  0x13   : > { %2937 = sst [smem:[#allocation20_spill]] %s2349_s19  ;;  %s43_s2 = sadd.s32 1, %s2349_s19 }
  0x14   : > { %2938 = sst [smem:[#allocation21_spill]] %s2353_s1  ;;  %s46_s23 = sadd.s32 1, %s2353_s1 }
  0x15   : > { %2939 = sst [smem:[#allocation22_spill]] %s2357_s20  ;;  %p44_p0 = scmp.ge.s32.totalorder %s43_s2, 2 }
  0x16   : > { %s441_s24 = sadd.s32 1, %s2337_s29  ;;  %p451_p1 = scmp.ne.s32.totalorder %s2337_s29, %s2333_s28 }
  0x17   : > { %p452_p2 = scmp.eq.s32.totalorder %s1750_s21, 3  ;;  %s2979_s2 = smov (%p44_p0, %s43_s2), 0 }
  0x18   : > { %2940 = sst [smem:[#allocation23_spill]] %s2979_s2  ;;  %s2981_s23 = smov (!%p44_p0, %s46_s23), %s2353_s1 }
  0x19   : > { %p2524_p3 = por %p452_p2, %p451_p1  ;;  %p457_p4 = scmp.ne.s32.totalorder %s2333_s28, %s2329_s27 }
  0x1a   : > { %p48_p5 = scmp.ge.s32.totalorder %s2981_s23, 2  ;;  %p458_p6 = scmp.eq.s32.totalorder %s1751_s22, 3 }
  0x1b   : > { %s2941_s25 = scalar_select %p2524_p3, 1, 0 }
  0x1c   : > { %p1752_p7 = scmp.ge.s32.totalorder %s2357_s20, 1  ;;  %p465_p8 = scmp.lt.s32.totalorder %s2357_s20, 5 }
  0x1d   : > { %2942 = sst [smem:[#allocation24_spill]] %s2941_s25  ;;  %s2983_s23 = smov (%p48_p5, %s2981_s23), 0 }
  0x1e   : > { %2943 = sst [smem:[#allocation25_spill]] %s2983_s23  ;;  %p2534_p9 = por %p458_p6, %p457_p4 }
  0x1f   : > { %p2538_p10 = pnand %p1752_p7, %p465_p8  ;;  %s438_s2 = ssub.s32 %s2353_s1, %s2983_s23 }
  0x20   : > { %s2944_s26 = scalar_select %p2534_p9, 1, 0 }
  0x21   : > { %s2946_s19 = scalar_select %p2538_p10, 1, 0 }
  0x22   : > { %2945 = sst [smem:[#allocation26_spill]] %s2944_s26  ;;  %p439_p11 = scmp.eq.s32.totalorder %s438_s2, 0 }
  0x23   : > { %p1963_p12 = pneg %p2538_p10  ;;  %p2546_p13 = scmp.eq.s32.totalorder %s1750_s21, 0 }
  0x24   : > { %s2551_s27 = scalar_select %p439_p11, %s2337_s29, %s441_s24  }
  0x25   : > { %s2947_s22 = scalar_select %p2546_p13, 1, 0 }
  0x26   : > { %2948 = sst [smem:[#allocation27_spill]] %s2551_s27  ;;  %p2555_p0 = pnand %p2546_p13, %p1963_p12 }
  0x27   : > { %s2359_s26 = smov [#allocation7]   ;;  %s2360_s23 = smov [#allocation10]  }
  0x28   : > { %s499_s18 = sshll.u32 %s2359_s26, 4  ;;  %s524_s2 = sshll.u32 %s2360_s23, 4  ;;  %s500_s18 = int_to_ptr.vmem [resolvable:$true] %s499_s18  ;;  %s525_s2 = int_to_ptr.vmem [resolvable:$true] %s524_s2 }
  0x29   : > { %s2111_s21 = scalar_lea.hbm %s2896_s6, 256  ;;  %p2567_p2 = pneg %p2555_p0 }
  0x2a   : > { %p2112_p1 = scmp.ne.s32.totalorder %s2896_s6, %s2111_s21  ;;  %p2118_p6 = scmp.lt.u32.totalorder %s2111_s21, %s2896_s6 }
  0x2c   : > { %p2114_p4 = pnand %p2567_p2, %p2112_p1 }
  0x2e   : > { %p2115_p5 = pneg %p2114_p4 }
  0x30   : > { %p2120_p7 = pnand %p2118_p6, %p2115_p5 }
  0x32   : > { %2123 = shalt.err (!%p2120_p7)
}
  0x33   : > { %s2124_s1 = scalar_lea.vmem %s500_s18, 256  ;;  %p2132_p9 = scmp.lt.s32.totalorder %s500_s18, %s500_s18 }
  0x34   : > { %p2125_p8 = scmp.ne.s32.totalorder %s500_s18, %s2124_s1  ;;  %p2133_p3 = scmp.lt.s32.totalorder %s2124_s1, %s2124_s1 }
  0x36   : > { %p2127_p11 = pnand %p2125_p8, %p2567_p2  ;;  %p2134_p13 = por %p2133_p3, %p2132_p9 }
  0x38   : > { %p2128_p12 = pneg %p2127_p11 }
  0x3a   : > { %p2135_p10 = pnand %p2134_p13, %p2128_p12 }
  0x3c   : > { %2138 = shalt.err (!%p2135_p10)
}
  0x3d   : > { %s2925_s16 = smov 64   ;;  %s2926_s17 = smov 4  }
  0x3e   : > { %1969 = dma.hbm_to_vmem [thread:$0]  (!%p2555_p0), %s2896_s6, 256, %s500_s18, [#allocation8], %s2925_s16, %s2925_s16, %s2926_s17  }
  0x3f   : > { %s2139_s26 = scalar_lea.hbm %s2898_s8, 16 }
  0x40   : > { %p2140_p3 = scmp.ne.s32.totalorder %s2898_s8, %s2139_s26  ;;  %p2146_p13 = scmp.lt.u32.totalorder %s2139_s26, %s2898_s8 }
  0x42   : > { %p2142_p9 = pnand %p2140_p3, %p2567_p2 }
  0x44   : > { %p2143_p10 = pneg %p2142_p9 }
  0x46   : > { %p2148_p1 = pnand %p2146_p13, %p2143_p10 }
  0x48   : > { %2151 = shalt.err (!%p2148_p1)
}
  0x49   : > { %s2152_s27 = scalar_lea.vmem %s525_s2, 16  ;;  %s2159_s18 = scalar_lea.vmem %s525_s2, 32 }
  0x4a   : > { %p2153_p4 = scmp.ne.s32.totalorder %s525_s2, %s2152_s27  ;;  %p2160_p7 = scmp.lt.s32.totalorder %s525_s2, %s525_s2 }
  0x4b   : > { %p2161_p8 = scmp.lt.s32.totalorder %s2159_s18, %s2152_s27 }
  0x4c   : > { %p2155_p5 = pnand %p2153_p4, %p2567_p2 }
  0x4d   : > { %p2162_p11 = por %p2161_p8, %p2160_p7 }
  0x4e   : > { %p2156_p6 = pneg %p2155_p5 }
  0x50   : > { %p2163_p12 = pnand %p2162_p11, %p2156_p6 }
  0x52   : > { %2166 = shalt.err (!%p2163_p12)
}
  0x53   : > { %1975 = dma.hbm_to_vmem [thread:$0]  (!%p2555_p0), %s2898_s8, 16, %s525_s2, [#allocation11]  }
  0x54   : > { %s2363_s14 = smov [#allocation4]   ;;  %s2364_s25 = smov [#allocation9]  }
  0x55   : > { %s483_s15 = sshll.u32 %s2363_s14, 4  ;;  %s513_s21 = sshll.u32 %s2364_s25, 4  ;;  %s484_s15 = int_to_ptr.vmem [resolvable:$true] %s483_s15  ;;  %s514_s21 = int_to_ptr.vmem [resolvable:$true] %s513_s21 }
  0x56   : > { %s2167_s16 = scalar_lea.hbm %s2894_s4, 256 }
  0x57   : > { %p2168_p3 = scmp.ne.s32.totalorder %s2894_s4, %s2167_s16  ;;  %p2174_p13 = scmp.lt.u32.totalorder %s2167_s16, %s2894_s4 }
  0x59   : > { %p2170_p9 = pnand %p2168_p3, %p2567_p2 }
  0x5b   : > { %p2171_p10 = pneg %p2170_p9 }
  0x5d   : > { %p2176_p1 = pnand %p2174_p13, %p2171_p10 }
  0x5f   : > { %2179 = shalt.err (!%p2176_p1)
}
  0x60   : > { %s2180_s2 = scalar_lea.vmem %s484_s15, 256  ;;  %p2188_p7 = scmp.lt.s32.totalorder %s484_s15, %s484_s15 }
  0x61   : > { %p2181_p4 = scmp.ne.s32.totalorder %s484_s15, %s2180_s2  ;;  %p2189_p8 = scmp.lt.s32.totalorder %s2180_s2, %s2180_s2 }
  0x63   : > { %p2183_p5 = pnand %p2181_p4, %p2567_p2  ;;  %p2190_p11 = por %p2189_p8, %p2188_p7 }
  0x65   : > { %p2184_p6 = pneg %p2183_p5 }
  0x67   : > { %p2191_p12 = pnand %p2190_p11, %p2184_p6 }
  0x69   : > { %2194 = shalt.err (!%p2191_p12)
}
  0x6a   : > { %s2951_s23 = smov 4   ;;  %s2952_s14 = smov 64  }
  0x6b   : > { %1966 = dma.hbm_to_vmem [thread:$0]  (!%p2555_p0), %s2894_s4, 256, %s484_s15, [#allocation5], %s2952_s14, %s2952_s14, %s2951_s23  }
  0x6c   : > { %s2195_s1 = scalar_lea.hbm %s2897_s7, 16 }
  0x6d   : > { %p2196_p3 = scmp.ne.s32.totalorder %s2897_s7, %s2195_s1  ;;  %p2202_p13 = scmp.lt.u32.totalorder %s2195_s1, %s2897_s7 }
  0x6f   : > { %p2198_p9 = pnand %p2196_p3, %p2567_p2 }
  0x71   : > { %p2199_p10 = pneg %p2198_p9 }
  0x73   : > { %p2204_p1 = pnand %p2202_p13, %p2199_p10 }
  0x75   : > { %2207 = shalt.err (!%p2204_p1)
}
  0x76   : > { %s2208_s17 = scalar_lea.vmem %s514_s21, 16  ;;  %s2215_s15 = scalar_lea.vmem %s514_s21, 32 }
  0x77   : > { %p2209_p4 = scmp.ne.s32.totalorder %s514_s21, %s2208_s17  ;;  %p2216_p7 = scmp.lt.s32.totalorder %s514_s21, %s514_s21 }
  0x78   : > { %p2217_p8 = scmp.lt.s32.totalorder %s2215_s15, %s2208_s17 }
  0x79   : > { %p2211_p5 = pnand %p2209_p4, %p2567_p2 }
  0x7a   : > { %p2218_p11 = por %p2217_p8, %p2216_p7 }
  0x7b   : > { %p2212_p6 = pneg %p2211_p5 }
  0x7d   : > { %p2219_p12 = pnand %p2218_p11, %p2212_p6 }
  0x7f   : > { %2222 = shalt.err (!%p2219_p12)
}
  0x80   : > { %1972 = dma.hbm_to_vmem [thread:$0]  (!%p2555_p0), %s2897_s7, 16, %s514_s21, [#allocation8]  }
  0x81   : > { %s2365_s16 = smov [#allocation12]   ;;  %s2223_s27 = scalar_lea.hbm %s2899_s9, 16 }
  0x82   : > { %s535_s25 = sshll.u32 %s2365_s16, 4  ;;  %p2224_p3 = scmp.ne.s32.totalorder %s2899_s9, %s2223_s27  ;;  %s536_s25 = int_to_ptr.vmem [resolvable:$true] %s535_s25 }
  0x83   : > { %p2230_p13 = scmp.lt.u32.totalorder %s2223_s27, %s2899_s9 }
  0x84   : > { %p2226_p9 = pnand %p2224_p3, %p2567_p2 }
  0x86   : > { %p2227_p10 = pneg %p2226_p9 }
  0x88   : > { %p2232_p1 = pnand %p2230_p13, %p2227_p10 }
  0x8a   : > { %2235 = shalt.err (!%p2232_p1)
}
  0x8b   : > { %s2236_s21 = scalar_lea.vmem %s536_s25, 16  ;;  %s2243_s15 = scalar_lea.vmem %s536_s25, 32 }
  0x8c   : > { %p2237_p4 = scmp.ne.s32.totalorder %s536_s25, %s2236_s21  ;;  %p2244_p7 = scmp.lt.s32.totalorder %s536_s25, %s536_s25 }
  0x8d   : > { %p2245_p8 = scmp.lt.s32.totalorder %s2243_s15, %s2236_s21 }
  0x8e   : > { %p2239_p5 = pnand %p2237_p4, %p2567_p2 }
  0x8f   : > { %p2246_p11 = por %p2245_p8, %p2244_p7 }
  0x90   : > { %p2240_p6 = pneg %p2239_p5 }
  0x92   : > { %p2247_p12 = pnand %p2246_p11, %p2240_p6 }
  0x94   : > { %2250 = shalt.err (!%p2247_p12)
}
  0x95   : > { %1978 = dma.hbm_to_vmem [thread:$0]  (!%p2555_p0), %s2899_s9, 16, %s536_s25, [#allocation11]  }
  0x96   : > { %p2953_p3 = scmp.ne.s32.totalorder %s2946_s19, 0 }
  0x97   : > { %p2954_p9 = scmp.ne.s32.totalorder (!%p2953_p3), %s2947_s22, 0 }
  0x98   : > { %586 = sbr.rel (%p2953_p3) target bundleno = 3083 (0xc0b), region = 92 }
  0x9f   : > { %2312 = dma.done.wait (%p2954_p9), [#allocation5], 256  }
  0xa0   : > { %2314 = vsyncadd (%p2954_p9), [#allocation5], 4294967040 }
  0xa1   : > { %2316 = dma.done.wait (%p2954_p9), [#allocation8], 272  }
  0xa2   : > { %2318 = vsyncadd (%p2954_p9), [#allocation8], 4294967024 }
  0xa3   : > { %2320 = dma.done.wait (%p2954_p9), [#allocation11], 32  }
  0xa4   : > { %2322 = vsyncadd (%p2954_p9), [#allocation11], 4294967264  ;;  %s656_s19 = sand.u32 1, %s2333_s28   ;;  %p659_p0 = scmp.lt.s32.totalorder %s2345_s0, 1 }
  0xa5   : > { %s2679_s20 = sshll.u32 %s656_s19, 3  ;;  %s2955_s1 = sld [smem:[#allocation28_spill]] }
  0xa6   : > { %s660_s24 = scalar_select %p659_p0, %s2345_s0, 1 }
  0xa7   : > { %s2956_s22 = sld [smem:[#allocation29_spill]]  ;;  %s658_s17 = scalar_lea.vmem [#allocation13], %s2679_s20 }
  0xa8   : > { %s1766_s16 = sshll.u32 %s660_s24, 3  ;;  %p1768_p2 = scmp.ne.s32.totalorder %s2341_s30, 0 }
  0xa9   : > { %vm673_vm0 = vcmask (!%p1768_p2), 261120  }
  0xaa   : > { %671 = sbr.rel (%p1768_p2) target bundleno = 177 (0xb1), region = 116 }
  0xab   : > { %s662_s27 = scalar_lea.vmem %s2955_s1, %s1766_s16 }
  0xac   : > { %v672_v0 = vld [vmem:[%s662_s27] sm:$0xff] (!%p1768_p2) }
  0xad   : > { %s666_s2 = scalar_lea.vmem %s2956_s22, %s1766_s16  ;;  %674 = vst.msk [vmem:[#allocation2] sm:$0xff] (!%p1768_p2), %vm673_vm0, %v672_v0 }
  0xb1 PF: > { %s2957_s23 = sld [smem:[#allocation30_spill]]  ;;  %v2366_v2 = vmov 0.0   ;;  %vm2367_vm1 = vmmov 0   ;;  %v676_v5 = vld [vmem:[%s666_s2] sm:$0xff]  ;;  %vm702_vm2 = vcmask 261120   ;;  %s2368_s26 = smov 96  }
  0xb2   : > { %1849 = vmatprep.subr.bf16.mxu1 %v2366_v2  ;;  %1865 = vmatprep.subr.bf16.mxu0 %v2366_v2  ;;  %v1769_v8 = vld [vmem:[%s2893_s3] ss:$0 sm:$0xff]  ;;  %s2369_s1 = smov 120   ;;  %s2370_s27 = smov 88   ;;  %v2079_v17 = vld [vmem:[#allocation4] sm:$0xff]   ;;  %v2080_v18 = vld [vmem:[#allocation4 + $0x8] sm:$0xff]  }
  0xb3   : > { %1853 = vmatprep.mubr.msk.bf16.mxu1 %vm2367_vm1, %v2366_v2  ;;  %1867 = vmatprep.mubr.msk.bf16.mxu0 %vm2367_vm1, %v2366_v2  ;;  %s2371_s18 = smov 80   ;;  %s2372_s29 = smov 112   ;;  %vm820_vm3 = vcmask 64512   ;;  %v1773_v51 = vld [vmem:[%s2895_s5] ss:$0 sm:$0xff]  ;;  %vm882_vm4 = vcmask 1043456  }
  0xb4   : > { %v2700_v4 = vld [vmem:[#allocation2] sm:$0xff]  ;;  %s2373_s22 = smov 72   ;;  %s2374_s2 = smov 104   ;;  %vm927_vm5 = vcmask 60416   ;;  %vm1048_vm6 = vcmask 126016   ;;  %vm1167_vm7 = vcmask 191616  }
  0xb5   : > { %v677_v6 = vadd.f32 %v676_v5, %v2700_v4  ;;  %v746_v19 = vpack.c.bf16 %v2700_v4, %v2700_v4  ;;  %s2375_s14 = smov 8   ;;  %s2376_s24 = smov 16   ;;  %vm1286_vm8 = vcmask 257216   ;;  %vm1494_vm9 = vcmask 523264  }
  0xb6   : > { %s2377_s16 = smov 24   ;;  %s2959_s21 = sld [smem:[#allocation32_spill]] }
  0xb7   : > { %v2077_v1 = vld [vmem:[%s2957_s23] sm:$0xff]   ;;  %v2078_v3 = vld [vmem:[%s2957_s23 + $0x8] sm:$0xff]   ;;  %v678_v7 = vpack.c.bf16 %v677_v6, %v677_v6  ;;  %p1806_p10 = scmp.ne.s32.totalorder %s2341_s30, 1 }
  0xb8   : > { %1850 = vmatpush3.bf16.msra.mxu1 %v2077_v1  ;;  %s2961_s25 = sld [smem:[#allocation34_spill]] (!%p1806_p10) }
  0xb9   : > { %1851 = vmatprep.subr.bf16.mxu1 %v2366_v2 }
  0xbc   : > { %1852 = vmatpush3.bf16.msra.mxu1 %v2078_v3 }
  0xbd   : > { %1857 = vmatprep.subr.bf16.mxu1 %v2366_v2 }
  0xbf   : > { %1854 = vmatmul.mubr.msk.bf16.vlgmr.msra.gmra.mrb[0].mxu1 %vm702_vm2, %v678_v7 }
  0xc0   : > { %1861 = vmatprep.mubr.msk.bf16.mxu1 %vm2367_vm1, %v2366_v2  ;;  %1858 = vmatpush3.bf16.msra.mxu1 %v2079_v17 }
  0xc1   : > { %1859 = vmatprep.subr.bf16.mxu1 %v2366_v2 }
  0xc4   : > { %1860 = vmatpush3.bf16.msra.mxu1 %v2080_v18 }
  0xc5   : > { %1871 = vmatprep.subr.bf16.mxu1 %v2366_v2 }
  0xc7   : > { %1862 = vmatmul.mubr.msk.bf16.vlgmr.msra.gmra.mrb[4].mxu1 %vm702_vm2, %v746_v19 }
  0xc8   : > { %1873 = vmatprep.mubr.msk.bf16.mxu1 %vm2367_vm1, %v2366_v2 }
 0x192   : > { %v740_v9 = vpop.f32.mrb[0].mxu1 }
 0x193   : > { %v741_v10 = vadd.f32 %v1769_v8, %v740_v9  ;;  %v1855_v11 = vpop.f32.mrb[1].mxu1 }
 0x194   : > { %v743_v12 = vpop.f32.mrb[2].mxu1 }
 0x195   : > { %v813_v13 = vmul.f32 0.35355338, %v741_v10  ;;  %v815_v14 = vpack.c.bf16 %v741_v10, %v741_v10  ;;  %v1856_v15 = vpop.f32.mrb[3].mxu1 }
 0x197   : > { %v814_v16 = vpack.c.bf16 %v813_v13, %v813_v13  ;;  %818 = vrot.lane.b32.xlu0 %v815_v14, %s2368_s26 }
 0x199   : > { %930 = vrot.lane.b32.xlu1 %v814_v16, %s2369_s1 }
 0x19a   : > { %v807_v52 = vpop.f32.mrb[4].mxu1 }
 0x19b   : > { %932 = vrot.lane.b32.xlu0 %v815_v14, %s2370_s27  ;;  %v808_v53 = vadd.f32 %v1773_v51, %v807_v52  ;;  %v1863_v54 = vpop.f32.mrb[5].mxu1 }
 0x19c   : > { %v810_v55 = vpop.f32.mrb[6].mxu1  ;;  %v2081_v54 = vld [vmem:[#allocation7] sm:$0xff]  }
 0x19d   : > { %1052 = vrot.lane.b32.xlu1 %v815_v14, %s2371_s18  ;;  %v1864_v56 = vpop.f32.mrb[7].mxu1  ;;  %v816_v57 = vpack.c.bf16 %v808_v53, %v808_v53  ;;  %v2082_v55 = vld [vmem:[#allocation7 + $0x8] sm:$0xff]  }
 0x19f   : > { %1050 = vrot.lane.b32.xlu0 %v814_v16, %s2372_s29  ;;  %v884_v58 = vsel %vm882_vm4, %v816_v57, 0 }
 0x1a0   : > { %1872 = vmatpush3.bf16.msra.mxu1 %v884_v58 }
 0x1a1   : > { %1171 = vrot.lane.b32.xlu1 %v815_v14, %s2373_s22  ;;  %1883 = vmatprep.subr.bf16.mxu1 %v2366_v2 }
 0x1a3   : > { %1169 = vrot.lane.b32.xlu0 %v814_v16, %s2374_s2 }
 0x209   : > { %v819_v20 = vpop.permute.xlu0 %818 }
 0x20a   : > { %v825_v21 = vsel %vm820_vm3, %v819_v20, 0 }
 0x20b   : > { %1866 = vmatpush3.bf16.xpose.msra.mxu0 %v825_v21  ;;  %v931_v23 = vpop.permute.xlu1 %930 }
 0x20c   : > { %1877 = vmatprep.subr.bf16.mxu0 %v2366_v2 }
 0x20d   : > { %v933_v22 = vpop.permute.xlu0 %932 }
 0x20e   : > { %v938_v24 = vsel %vm820_vm3, %v933_v22, 0 }
 0x20f   : > { %v1053_v25 = vpop.permute.xlu1 %1052 }
 0x210   : > { %v1058_v26 = vsel %vm820_vm3, %v1053_v25, 0 }
 0x211   : > { %v1051_v28 = vpop.permute.xlu0 %1050 }
 0x212   : > { %1868 = vmatmul.mubr.msk.bf16.vlgmr.msra.gmra.mrb[0].mxu0 %vm820_vm3, %v814_v16 }
 0x213   : > { %1878 = vmatpush3.bf16.xpose.msra.mxu0 %v938_v24  ;;  %1879 = vmatprep.mubr.msk.bf16.mxu0 %vm2367_vm1, %v2366_v2  ;;  %v1172_v27 = vpop.permute.xlu1 %1171 }
 0x214   : > { %1889 = vmatprep.subr.bf16.mxu0 %v2366_v2  ;;  %v1177_v29 = vsel %vm820_vm3, %v1172_v27, 0 }
 0x215   : > { %v1170_v30 = vpop.permute.xlu0 %1169 }
 0x21a   : > { %1880 = vmatmul.mubr.msk.bf16.vlgmr.msra.gmra.mrb[4].mxu0 %vm820_vm3, %v931_v23 }
 0x21b   : > { %1890 = vmatpush3.bf16.xpose.msra.mxu0 %v1058_v26  ;;  %1891 = vmatprep.mubr.msk.bf16.mxu0 %vm2367_vm1, %v2366_v2 }
 0x21c   : > { %1901 = vmatprep.subr.bf16.mxu0 %v2366_v2 }
 0x222   : > { %1892 = vmatmul.mubr.msk.bf16.vlgmr.msra.gmra.mrb[8].mxu0 %vm820_vm3, %v1051_v28 }
 0x223   : > { %1902 = vmatpush3.bf16.xpose.msra.mxu0 %v1177_v29  ;;  %1903 = vmatprep.mubr.msk.bf16.mxu0 %vm2367_vm1, %v2366_v2 }
 0x224   : > { %1913 = vmatprep.subr.bf16.mxu0 %v2366_v2 }
 0x22a   : > { %1904 = vmatmul.mubr.msk.bf16.vlgmr.msra.gmra.mrb[12].mxu0 %vm820_vm3, %v1170_v30 }
 0x22b   : > { %1917 = vmatprep.mubr.msk.bf16.mxu0 %vm2367_vm1, %v2366_v2  ;;  %1914 = vmatpush3.bf16.msra.mxu0 %v2081_v54 }
 0x22c   : > { %1915 = vmatprep.subr.bf16.mxu0 %v2366_v2 }
 0x22f   : > { %1916 = vmatpush3.bf16.msra.mxu0 %v2082_v55 }
 0x230   : > { %1929 = vmatprep.subr.bf16.mxu0 %v2366_v2 }
 0x2e5   : > { %v861_v31 = vpop.f32.mrb[0].mxu0 }
 0x2e6   : > { %v1869_v32 = vpop.f32.mrb[1].mxu0  ;;  %v867_v33 = vsel %vm820_vm3, %v861_v31, -inf }
 0x2e7   : > { %868 = vmax.xlane.f32.xlu1 %v867_v33  ;;  %v864_v34 = vpop.f32.mrb[2].mxu0 }
 0x2e8   : > { %v1870_v35 = vpop.f32.mrb[3].mxu0 }
 0x2ed   : > { %v974_v36 = vpop.f32.mrb[4].mxu0 }
 0x2ee   : > { %v1881_v37 = vpop.f32.mrb[5].mxu0  ;;  %v980_v38 = vsel %vm820_vm3, %v974_v36, -inf }
 0x2ef   : > { %981 = vmax.xlane.f32.xlu0 %v980_v38  ;;  %v977_v39 = vpop.f32.mrb[6].mxu0 }
 0x2f0   : > { %v1882_v40 = vpop.f32.mrb[7].mxu0 }
 0x2f5   : > { %v1094_v41 = vpop.f32.mrb[8].mxu0 }
 0x2f6   : > { %v1893_v42 = vpop.f32.mrb[9].mxu0  ;;  %v1100_v43 = vsel %vm820_vm3, %v1094_v41, -inf }
 0x2f7   : > { %1101 = vmax.xlane.f32.xlu0 %v1100_v43  ;;  %v1097_v44 = vpop.f32.mrb[10].mxu0 }
 0x2f8   : > { %v1894_v45 = vpop.f32.mrb[11].mxu0 }
 0x2fd   : > { %v1213_v46 = vpop.f32.mrb[12].mxu0 }
 0x2fe   : > { %v1905_v47 = vpop.f32.mrb[13].mxu0  ;;  %v1219_v48 = vsel %vm820_vm3, %v1213_v46, -inf }
 0x2ff   : > { %1220 = vmax.xlane.f32.xlu1 %v1219_v48  ;;  %v1216_v49 = vpop.f32.mrb[14].mxu0 }
 0x300   : > { %v1906_v50 = vpop.f32.mrb[15].mxu0 }
 0x374   : > { %v869_v59 = vpop.xlane.xlu1 %868 }
 0x375   : > { %v870_v60 = vsub.f32 %v861_v31, %v869_v59 }
 0x377   : > { %v871_v61 = vmul.f32 1.442695, %v870_v60 }
 0x379   : > { %2089 = vpow2.f32 %v871_v61 }
 0x37c   : > { %v982_v62 = vpop.xlane.xlu0 %981 }
 0x37d   : > { %v983_v63 = vsub.f32 %v974_v36, %v982_v62 }
 0x37f   : > { %v984_v0 = vmul.f32 1.442695, %v983_v63 }
 0x381   : > { %2091 = vpow2.f32 %v984_v0 }
 0x383   : > { %v2090_v1 = vpop.eup %2089 }
 0x384   : > { %v1102_v3 = vpop.xlane.xlu0 %1101  ;;  %v873_v5 = vsel %vm820_vm3, %v2090_v1, 0.0 }
 0x385   : > { %v1103_v6 = vsub.f32 %v1094_v41, %v1102_v3  ;;  %874 = vadd.xlane.f32.xlu0 %v873_v5 }
 0x387   : > { %v1104_v7 = vmul.f32 1.442695, %v1103_v6 }
 0x389   : > { %2093 = vpow2.f32 %v1104_v7 }
 0x38b   : > { %v2092_v8 = vpop.eup %2091 }
 0x38c   : > { %v986_v9 = vsel %vm820_vm3, %v2092_v8, 0.0  ;;  %v1221_v12 = vpop.xlane.xlu1 %1220 }
 0x38d   : > { %987 = vadd.xlane.f32.xlu1 %v986_v9  ;;  %v1222_v13 = vsub.f32 %v1213_v46, %v1221_v12 }
 0x38f   : > { %v1223_v14 = vmul.f32 1.442695, %v1222_v13 }
 0x391   : > { %2095 = vpow2.f32 %v1223_v14 }
 0x393   : > { %v2094_v10 = vpop.eup %2093 }
 0x394   : > { %v1106_v11 = vsel %vm820_vm3, %v2094_v10, 0.0 }
 0x395   : > { %1107 = vadd.xlane.f32.xlu0 %v1106_v11 }
 0x39b   : > { %v2096_v15 = vpop.eup %2095 }
 0x39c   : > { %v1225_v16 = vsel %vm820_vm3, %v2096_v15, 0.0 }
 0x39e   : > { %1112 = vrot.lane.b32.xlu1 %v816_v57, %s2372_s29  ;;  %s2958_s29 = sld [smem:[#allocation31_spill]] }
 0x3a4   : > { %v1804_v55 = vld [vmem:[%s2958_s29] ss:$0 sm:$0xff] }
 0x3ab   : > { %993 = vrot.lane.b32.xlu0 %v816_v57, %s2369_s1 }
 0x3c2   : > { %1226 = vadd.xlane.f32.xlu1 %v1225_v16  ;;  %v2083_v16 = vld [vmem:[%s2900_s10] sm:$0xff]  }
 0x3d3   : > { %1231 = vrot.lane.b32.xlu1 %v816_v57, %s2374_s2 }
 0x412   : > { %v875_v17 = vpop.xlane.xlu0 %874 }
 0x413   : > { %2097 = vrcp.f32 %v875_v17  ;;  %v2085_v17 = vld [vmem:[%s2902_s12] sm:$0xff]  }
 0x41a   : > { %v988_v18 = vpop.xlane.xlu1 %987 }
 0x41b   : > { %2099 = vrcp.f32 %v988_v18  ;;  %v2086_v18 = vld [vmem:[%s2902_s12 + $0x8] sm:$0xff]  }
 0x41d   : > { %v2098_v19 = vpop.eup %2097 }
 0x41e   : > { %v877_v20 = vmul.f32 %v2098_v19, %v2090_v1  ;;  %v1113_v27 = vpop.permute.xlu1 %1112  ;;  %v1788_v1 = vld [vmem:[#allocation9] ss:$0 sm:$0xff] }
 0x41f   : > { %v1118_v29 = vsel %vm882_vm4, %v1113_v27, 0 }
 0x420   : > { %v878_v21 = vpack.c.bf16 %v877_v20, %v877_v20 }
 0x422   : > { %v1108_v22 = vpop.xlane.xlu0 %1107  ;;  %1874 = vmatmul.mubr.msk.bf16.vlgmr.msra.gmra.mrb[8].mxu1 %vm820_vm3, %v878_v21 }
 0x423   : > { %2101 = vrcp.f32 %v1108_v22  ;;  %1885 = vmatprep.mubr.msk.bf16.mxu1 %vm2367_vm1, %v2366_v2 }
 0x425   : > { %v2100_v23 = vpop.eup %2099 }
 0x426   : > { %v990_v24 = vmul.f32 %v2100_v23, %v2092_v8  ;;  %v994_v25 = vpop.permute.xlu0 %993  ;;  %v1792_v23 = vld [vmem:[#allocation10] ss:$0 sm:$0xff] }
 0x427   : > { %v999_v26 = vsel %vm882_vm4, %v994_v25, 0  ;;  %v1793_v25 = vld [vmem:[#allocation12] ss:$0 sm:$0xff] }
 0x428   : > { %1884 = vmatpush3.bf16.msra.mxu1 %v999_v26  ;;  %v991_v28 = vpack.c.bf16 %v990_v24, %v990_v24 }
 0x429   : > { %1895 = vmatprep.subr.bf16.mxu1 %v2366_v2 }
 0x42b   : > { %1886 = vmatmul.mubr.msk.bf16.vlgmr.msra.gmra.mrb[12].mxu1 %vm820_vm3, %v991_v28 }
 0x42c   : > { %1896 = vmatpush3.bf16.msra.mxu1 %v1118_v29  ;;  %1897 = vmatprep.mubr.msk.bf16.mxu1 %vm2367_vm1, %v2366_v2  ;;  %v2087_v29 = vld [vmem:[%s2902_s12 + $0x10] sm:$0xff]  }
 0x42d   : > { %v2102_v30 = vpop.eup %2101  ;;  %1907 = vmatprep.subr.bf16.mxu1 %v2366_v2 }
 0x42e   : > { %v1110_v31 = vmul.f32 %v2102_v30, %v2094_v10  ;;  %v2088_v30 = vld [vmem:[%s2902_s12 + $0x18] sm:$0xff]  }
 0x430   : > { %v1111_v32 = vpack.c.bf16 %v1110_v31, %v1110_v31  ;;  %v1794_v31 = vld [vmem:[%s2901_s11] ss:$0 sm:$0xff] }
 0x433   : > { %1898 = vmatmul.mubr.msk.bf16.vlgmr.msra.gmra.mrb[16].mxu1 %vm820_vm3, %v1111_v32 }
 0x434   : > { %1909 = vmatprep.mubr.msk.bf16.mxu1 %vm2367_vm1, %v2366_v2 }
 0x44f   : > { %v1227_v33 = vpop.xlane.xlu1 %1226 }
 0x450   : > { %2103 = vrcp.f32 %v1227_v33 }
 0x453   : > { %v1232_v34 = vpop.permute.xlu1 %1231 }
 0x454   : > { %v1237_v35 = vsel %vm882_vm4, %v1232_v34, 0 }
 0x455   : > { %1908 = vmatpush3.bf16.msra.mxu1 %v1237_v35 }
 0x456   : > { %1921 = vmatprep.subr.bf16.mxu1 %v2366_v2 }
 0x45a   : > { %v2104_v36 = vpop.eup %2103 }
 0x45b   : > { %v1229_v37 = vmul.f32 %v2104_v36, %v2096_v15 }
 0x45d   : > { %v1230_v38 = vpack.c.bf16 %v1229_v37, %v1229_v37 }
 0x45f   : > { %1910 = vmatmul.mubr.msk.bf16.vlgmr.msra.gmra.mrb[20].mxu1 %vm820_vm3, %v1230_v38 }
 0x460   : > { %1925 = vmatprep.mubr.msk.bf16.mxu1 %vm2367_vm1, %v2366_v2  ;;  %1922 = vmatpush3.bf16.msra.mxu1 %v2083_v16 }
 0x461   : > { %1923 = vmatprep.subr.bf16.mxu1 %v2366_v2 }
 0x4f5   : > { %v920_v39 = vpop.f32.mrb[8].mxu1 }
 0x4f6   : > { %v926_v40 = vpack.c.bf16 %v920_v39, %v920_v39  ;;  %v1875_v41 = vpop.f32.mrb[9].mxu1 }
 0x4f7   : > { %v923_v42 = vpop.f32.mrb[10].mxu1 }
 0x4f8   : > { %928 = vst.msk [vmem:[#allocation3] sm:$0xf] %vm927_vm5, %v926_v40  ;;  %v1876_v43 = vpop.f32.mrb[11].mxu1 }
 0x4fe   : > { %v1035_v44 = vpop.f32.mrb[12].mxu1 }
 0x4ff   : > { %v1813_v45 = vpack.c.bf16 %v1035_v44, %v1035_v44  ;;  %v1887_v46 = vpop.f32.mrb[13].mxu1 }
 0x500   : > { %v1038_v47 = vpop.f32.mrb[14].mxu1 }
 0x501   : > { %1045 = vrot.lane.b32.xlu0 %v1813_v45, %s2375_s14  ;;  %v1888_v48 = vpop.f32.mrb[15].mxu1  ;;  %s2960_s14 = sld [smem:[#allocation33_spill]] (!%p1806_p10) }
 0x506   : > { %v1154_v49 = vpop.f32.mrb[16].mxu1 }
 0x507   : > { %v1814_v50 = vpack.c.bf16 %v1154_v49, %v1154_v49  ;;  %v1899_v51 = vpop.f32.mrb[17].mxu1 }
 0x508   : > { %v1157_v52 = vpop.f32.mrb[18].mxu1 }
 0x509   : > { %1164 = vrot.lane.b32.xlu1 %v1814_v50, %s2376_s24  ;;  %v1900_v53 = vpop.f32.mrb[19].mxu1 }
 0x532   : > { %v1273_v56 = vpop.f32.mrb[20].mxu1 }
 0x533   : > { %v1815_v57 = vpack.c.bf16 %v1273_v56, %v1273_v56  ;;  %v1911_v58 = vpop.f32.mrb[21].mxu1 }
 0x534   : > { %v1276_v59 = vpop.f32.mrb[22].mxu1 }
 0x535   : > { %1283 = vrot.lane.b32.xlu0 %v1815_v57, %s2377_s16  ;;  %v1912_v60 = vpop.f32.mrb[23].mxu1  ;;  %v1805_v57 = vld [vmem:[%s2959_s21] ss:$0 sm:$0xff] }
 0x573   : > { %v1046_v61 = vpop.permute.xlu0 %1045 }
 0x574   : > { %1049 = vst.msk [vmem:[#allocation3] sm:$0xf] %vm1048_vm6, %v1046_v61 }
 0x57b   : > { %v1165_v62 = vpop.permute.xlu1 %1164 }
 0x57c   : > { %1168 = vst.msk [vmem:[#allocation3] sm:$0xf] %vm1167_vm7, %v1165_v62 }
 0x5a7   : > { %v1284_v63 = vpop.permute.xlu0 %1283 }
 0x5a8   : > { %1287 = vst.msk [vmem:[#allocation3] sm:$0xf] %vm1286_vm8, %v1284_v63 }
 0x5af   : > { %v1288_v0 = vld [vmem:[#allocation3] sm:$0xf] }
 0x5b0   : > { %1918 = vmatmul.mubr.msk.bf16.vlgmr.msra.gmra.mrb[16].mxu0 %vm702_vm2, %v1288_v0 }
 0x5b1   : > { %1937 = vmatprep.mubr.msk.bf16.mxu0 %vm2367_vm1, %v2366_v2  ;;  %1930 = vmatpush3.bf16.msra.mxu0 %v2085_v17 }
 0x5b2   : > { %1931 = vmatprep.subr.bf16.mxu0 %v2366_v2 }
 0x5b5   : > { %1932 = vmatpush3.bf16.msra.mxu0 %v2086_v18 }
 0x5b6   : > { %1933 = vmatprep.subr.bf16.mxu0 %v2366_v2 }
 0x5b9   : > { %1934 = vmatpush3.bf16.msra.mxu0 %v2087_v29 }
 0x5ba   : > { %1935 = vmatprep.subr.bf16.mxu0 %v2366_v2  ;;  %v1798_v2 = vld [vmem:[%s2903_s13] ss:$0 sm:$0xff] }
 0x5bd   : > { %1936 = vmatpush3.bf16.msra.mxu0 %v2088_v30 }
 0x683   : > { %v1349_v3 = vpop.f32.mrb[16].mxu0 }
 0x684   : > { %v1350_v5 = vadd.f32 %v1788_v1, %v1349_v3  ;;  %v1919_v6 = vpop.f32.mrb[17].mxu0 }
 0x685   : > { %v1352_v7 = vpop.f32.mrb[18].mxu0 }
 0x686   : > { %v1920_v8 = vpop.f32.mrb[19].mxu0  ;;  %v1355_v9 = vadd.f32 %v1350_v5, %v2700_v4  ;;  %v2084_v4 = vld [vmem:[%s2900_s10 + $0x8] sm:$0xff]  }
 0x687   : > { %1924 = vmatpush3.bf16.msra.mxu1 %v2084_v4 }
 0x688   : > { %v1358_v10 = vsel %vm702_vm2, %v1355_v9, 0.0 }
 0x689   : > { %1359 = vadd.xlane.f32.xlu1 %v1358_v10 }
 0x716   : > { %v1360_v11 = vpop.xlane.xlu1 %1359 }
 0x717   : > { %v1362_v12 = vmul.f32 0.03125, %v1360_v11  ;;  %v1808_v11 = vld [vmem:[%s2961_s25] ss:$0 sm:$0xff] (!%p1806_p10) }
 0x719   : > { %v1363_v13 = vsub.f32 %v1355_v9, %v1362_v12  ;;  %v1807_v9 = vld [vmem:[%s2960_s14] ss:$0 sm:$0xff] (!%p1806_p10) }
 0x71b   : > { %v1364_v14 = vmul.f32 %v1363_v13, %v1363_v13 }
 0x71d   : > { %v1365_v15 = vsel %vm702_vm2, %v1364_v14, 0.0 }
 0x71e   : > { %1366 = vadd.xlane.f32.xlu0 %v1365_v15 }
 0x7ab   : > { %v1367_v19 = vpop.xlane.xlu0 %1366 }
 0x7ac   : > { %v1368_v20 = vmul.f32 0.03125, %v1367_v19 }
 0x7ae   : > { %v1369_v21 = vadd.f32 1e-05, %v1368_v20 }
 0x7b0   : > { %2105 = vrsqrt.f32 %v1369_v21 }
 0x7ba   : > { %v2106_v22 = vpop.eup %2105 }
 0x7bb   : > { %v1371_v24 = vmul.f32 %v2106_v22, %v1363_v13 }
 0x7bd   : > { %v1378_v26 = vmul.f32 %v1792_v23, %v1371_v24 }
 0x7bf   : > { %v1385_v27 = vadd.f32 %v1793_v25, %v1378_v26 }
 0x7c1   : > { %v1386_v28 = vpack.c.bf16 %v1385_v27, %v1385_v27 }
 0x7c3   : > { %1926 = vmatmul.mubr.msk.bf16.vlgmr.msra.gmra.mrb[24].mxu1 %vm702_vm2, %v1386_v28 }
 0x896   : > { %v1447_v32 = vpop.f32.mrb[24].mxu1 }
 0x897   : > { %v1448_v33 = vadd.f32 %v1794_v31, %v1447_v32  ;;  %v1927_v34 = vpop.f32.mrb[25].mxu1 }
 0x898   : > { %v1450_v35 = vpop.f32.mrb[26].mxu1 }
 0x899   : > { %v1453_v36 = vmax.f32 %v1448_v33, 0.0  ;;  %v1928_v37 = vpop.f32.mrb[27].mxu1 }
 0x89b   : > { %v1454_v38 = vpack.c.bf16 %v1453_v36, %v1453_v36 }
 0x89d   : > { %1938 = vmatmul.mubr.msk.bf16.vlgmr.msra.gmra.mrb[20].mxu0 %vm1494_vm9, %v1454_v38 }
 0x970   : > { %v1532_v39 = vpop.f32.mrb[20].mxu0 }
 0x971   : > { %v1533_v40 = vadd.f32 %v1798_v2, %v1532_v39  ;;  %v1939_v41 = vpop.f32.mrb[21].mxu0 }
 0x972   : > { %v1535_v42 = vpop.f32.mrb[22].mxu0 }
 0x973   : > { %v1940_v43 = vpop.f32.mrb[23].mxu0  ;;  %v1538_v44 = vadd.f32 %v1533_v40, %v1385_v27 }
 0x975   : > { %v1541_v45 = vsel %vm702_vm2, %v1538_v44, 0.0 }
 0x976   : > { %1542 = vadd.xlane.f32.xlu0 %v1541_v45 }
 0xa03   : > { %v1543_v46 = vpop.xlane.xlu0 %1542 }
 0xa04   : > { %v1544_v47 = vmul.f32 0.03125, %v1543_v46 }
 0xa06   : > { %v1545_v48 = vsub.f32 %v1538_v44, %v1544_v47 }
 0xa08   : > { %v1546_v49 = vmul.f32 %v1545_v48, %v1545_v48 }
 0xa0a   : > { %v1547_v50 = vsel %vm702_vm2, %v1546_v49, 0.0 }
 0xa0b   : > { %1548 = vadd.xlane.f32.xlu1 %v1547_v50 }
 0xa98   : > { %v1549_v51 = vpop.xlane.xlu1 %1548 }
 0xa99   : > { %v1550_v52 = vmul.f32 0.03125, %v1549_v51 }
 0xa9b   : > { %v1551_v53 = vadd.f32 1e-05, %v1550_v52 }
 0xa9d   : > { %2107 = vrsqrt.f32 %v1551_v53 }
 0xaa7   : > { %v2108_v54 = vpop.eup %2107 }
 0xaa8   : > { %v1553_v56 = vmul.f32 %v2108_v54, %v1545_v48  ;;  %1572 = sbr.rel (%p1806_p10) target bundleno = 3056 (0xbf0), region = 120 }
 0xaaa   : > { %v1560_v58 = vmul.f32 %v1804_v55, %v1553_v56 }
 0xaac   : > { %v1567_v59 = vadd.f32 %v1805_v57, %v1560_v58 }
 0xaae   : > { %1568 = vst.msk [vmem:[#allocation2] sm:$0xff] %vm702_vm2, %v1567_v59 }
 0xab5   : > { %v1573_v60 = vld [vmem:[#allocation2] sm:$0xff] }
 0xab6   : > { %v1576_v61 = vsel %vm702_vm2, %v1573_v60, 0.0 }
 0xab7   : > { %1577 = vadd.xlane.f32.xlu0 %v1576_v61 }
 0xb44   : > { %v1578_v62 = vpop.xlane.xlu0 %1577 }
 0xb45   : > { %v1579_v63 = vmul.f32 0.03125, %v1578_v62 }
 0xb47   : > { %v1580_v0 = vsub.f32 %v1573_v60, %v1579_v63 }
 0xb49   : > { %v1581_v1 = vmul.f32 %v1580_v0, %v1580_v0 }
 0xb4b   : > { %v1582_v3 = vsel %vm702_vm2, %v1581_v1, 0.0 }
 0xb4c   : > { %1583 = vadd.xlane.f32.xlu0 %v1582_v3 }
 0xbd9   : > { %v1584_v5 = vpop.xlane.xlu0 %1583 }
 0xbda   : > { %v1585_v6 = vmul.f32 0.03125, %v1584_v5 }
 0xbdc   : > { %v1586_v7 = vadd.f32 1e-05, %v1585_v6 }
 0xbde   : > { %2109 = vrsqrt.f32 %v1586_v7 }
 0xbe8   : > { %v2110_v8 = vpop.eup %2109 }
 0xbe9   : > { %v1588_v10 = vmul.f32 %v2110_v8, %v1580_v0 }
 0xbeb   : > { %v1595_v12 = vmul.f32 %v1807_v9, %v1588_v10 }
 0xbed   : > { %v1602_v13 = vadd.f32 %v1808_v11, %v1595_v12 }
 0xbef   : > { %1603 = vst.msk [vmem:[%s658_s17] sm:$0xff] %vm702_vm2, %v1602_v13 }
 0xbf0 PF: > { %s2962_s26 = sld [smem:[#allocation24_spill]]  ;;  %s1810_s1 = sshll.u32 %s2345_s0, 7 }
 0xbf1   : > { %s2963_s29 = sld [smem:[#allocation35_spill]]  ;;  %s1618_s21 = sshll.u32 %s658_s17, 4  ;;  %s1619_s21 = int_to_ptr.vmem [resolvable:$true] %s1618_s21 }
 0xbf2   : > { %s1605_s15 = scalar_lea.sflag [#allocation6], %s656_s19  ;;  %s2251_s30 = scalar_lea.vmem %s1619_s21, 128 }
 0xbf3   : > { %p2252_p13 = scmp.ne.s32.totalorder %s1619_s21, %s2251_s30  ;;  %s2378_s14 = smov [#allocation13]  }
 0xbf4   : > { %s2255_s24 = sshll.u32 %s2378_s14, 4  ;;  %s2256_s24 = int_to_ptr.vmem [resolvable:$false] %s2255_s24 }
 0xbf5   : > { %s2257_s16 = scalar_lea.vmem %s2256_s24, 256  ;;  %p2258_p6 = scmp.lt.s32.totalorder %s1619_s21, %s2256_s24 }
 0xbf6   : > { %p2965_p1 = scmp.ne.s32.totalorder %s2962_s26, 0  ;;  %p2259_p7 = scmp.lt.s32.totalorder %s2257_s16, %s2251_s30 }
 0xbf7   : > { %s2964_s22 = smov %s2963_s29  ;;  %s2839_s2 = scalar_lea.hbm %s2963_s29, %s1810_s1 }
 0xbf8   : > { %p2253_p4 = pnand %p2252_p13, %p2965_p1  ;;  %p2260_p8 = por %p2259_p7, %p2258_p6 }
 0xbfa   : > { %p2254_p5 = pneg %p2253_p4 }
 0xbfc   : > { %p2261_p11 = pnand %p2260_p8, %p2254_p5 }
 0xbfe   : > { %2264 = shalt.err (!%p2261_p11)
}
 0xbff   : > { %s2265_s0 = scalar_lea.hbm %s2839_s2, 128  ;;  %s2269_s17 = scalar_lea.hbm %s2964_s22, 256 }
 0xc00   : > { %p2266_p12 = scmp.ne.s32.totalorder %s2839_s2, %s2265_s0  ;;  %p2270_p0 = scmp.lt.u32.totalorder %s2839_s2, %s2964_s22 }
 0xc01   : > { %p2271_p2 = scmp.lt.u32.totalorder %s2269_s17, %s2265_s0  ;;  %p2273_p13 = scmp.lt.u32.totalorder %s2265_s0, %s2839_s2 }
 0xc02   : > { %p2267_p3 = pnand %p2266_p12, %p2965_p1 }
 0xc03   : > { %p2272_p10 = por %p2271_p2, %p2270_p0 }
 0xc04   : > { %p2268_p9 = pneg %p2267_p3 }
 0xc05   : > { %p2274_p4 = por %p2273_p13, %p2272_p10 }
 0xc07   : > { %p2275_p5 = pnand %p2274_p4, %p2268_p9 }
 0xc09   : > { %2278 = shalt.err (!%p2275_p5)
}
 0xc0a   : > { %1961 = dma.vmem_to_hbm [thread:$0]  (%p2965_p1), %s1619_s21, 128, %s2839_s2, %s1605_s15  }
 0xc0b PF: > { %s2966_s27 = sld [smem:[#allocation22_spill]]  ;;  %s2967_s18 = sld [smem:[#allocation18_spill]] }
 0xc0c   : > { %s2968_s29 = sld [smem:[#allocation26_spill]] }
 0xc11   : > { %p1993_p6 = scmp.ge.s32.totalorder %s2966_s27, 2  ;;  %s1630_s30 = sand.u32 1, %s2967_s18  }
 0xc12   : > { %p2969_p7 = scmp.ne.s32.totalorder %s2968_s29, 0  ;;  %s1631_s14 = scalar_lea.sflag [#allocation6], %s1630_s30 }
 0xc14   : > { %p1980_p8 = pnand %p1993_p6, %p2969_p7 }
 0xc16   : > { %2324 = dma.done.wait (!%p1980_p8), %s1631_s14, 128  }
 0xc17   : > { %2326 = vsyncadd (!%p1980_p8), %s1631_s14, 4294967168  ;;  %s34_s20 = sadd.s32 1, %s2966_s27   ;;  %s2970_s24 = sld [smem:[#allocation19_spill]] }
 0xc18   : > { %p31_p11 = scmp.ge.s32.totalorder %s34_s20, 6   ;;  %s2971_s29 = sld [smem:[#allocation27_spill]] }
 0xc19   : > { %s2972_s30 = sld [smem:[#allocation20_spill]]  ;;  %s2973_s0 = sld [smem:[#allocation21_spill]] }
 0xc1a   : > { %s2974_s19 = sld [smem:[#allocation23_spill]]  ;;  %s2975_s1 = sld [smem:[#allocation25_spill]] }
 0xc1b   : > { %s2976_s27 = smov %s2333_s28  ;;  %33 = sbr.rel (!%p31_p11) target bundleno = 17 (0x11), region = 159 }
 0xc1d   : > { %s2977_s28 = smov %s2970_s24 }
 0xc22   :  { %1636 = vsyncpa [#allocation5], 1 }
 0xc23   :  { %1638 = vsyncpa [#allocation5 + $0x1], 1 }
 0xc24   :  { %1639 = vsyncpa [#allocation8], 1 }
 0xc25   :  { %1640 = vsyncpa [#allocation11], 1 }
 0xc26   :  { %1641 = vsyncpa [#allocation6], 1 }
 0xc27   :  { %1643 = vsyncpa [#allocation6 + $0x1], 1 }

</bundles_post_ra>
